<compile_context>
chip_gen: v5e
topology: v5e:2x2
jax: 0.10.0
libtpu: 0.0.40
codegen_flags: <defaults>
</compile_context>

<pallas_src>
import math
import functools

import jax
import jax.numpy as jnp
from jax.experimental import pallas as pl
from jax.experimental.pallas import tpu as pltpu


# -----------------------------------------------------------------------------
# Fused Pallas kernel: attention -> dilated causal convs -> residual, x4 levels
# -----------------------------------------------------------------------------

def _tcanet_fused_kernel(x_ref, *refs, level_meta, key_size, taps, seq_len):
    """Whole TCANet forward (temp_attn=True, eval) for one batch element.

    x_ref : [1, T, emb_size]
    refs  : per level -- wqkv [Cin, 2K+Cin], bqkv [1, 2K+Cin],
            num_sub_blocks x (taps conv-tap weights [Cin, Cout] ..., bias [1, Cout]),
            optionally (down_w [Cin, Cout], down_b [1, Cout]);
            then final_w [C_last, out], final_b [1, out];
            the final ref is the output [1, T, out].
    """
    out_ref = refs[-1]
    p_refs = refs[:-1]
    T = seq_len
    scale = 1.0 / math.sqrt(key_size)

    # Causal mask of the PyTorch AttentionBlock: logits[j, i] masked when i > j
    # (mask[j][i] = i > j, masked_fill(-inf)).  Hoisted out of the level loop.
    row = jax.lax.broadcasted_iota(jnp.int32, (T, T), 0)   # query position j
    col = jax.lax.broadcasted_iota(jnp.int32, (T, T), 1)   # key position i
    future = col > row

    def mm(a, b):
        # bf16 operands / f32 accumulate: full-rate MXU path on v6e/v7x.
        return jnp.dot(a.astype(jnp.bfloat16), b.astype(jnp.bfloat16),
                       preferred_element_type=jnp.float32)

    def causal_shift(a, d):
        # out[t] = a[t - d], zeros for t < d.  Reproduces Conv1d(padding=(k-1)*d)
        # + Chomp1d without materializing a padded copy in HBM.
        if d == 0:
            return a
        zeros = jnp.zeros((d, a.shape[1]), a.dtype)
        return jnp.concatenate([zeros, a[:T - d, :]], axis=0)

    x = x_ref[0].astype(jnp.float32)                        # [T, C_in]
    p = 0
    for (dilation, n_convs, has_down) in level_meta:
        wqkv = p_refs[p][...]; bqkv = p_refs[p + 1][...]
        p += 2
        x_b = x.astype(jnp.bfloat16)                        # hoisted cast, reused

        # ---- AttentionBlock (fused QKV matmul) ----
        qkv = mm(x_b, wqkv) + bqkv                          # [T, 2K + Cin]
        q = qkv[:, :key_size]
        k = qkv[:, key_size:2 * key_size]
        v = qkv[:, 2 * key_size:]
        logits = mm(q, k.T) * scale                         # [T, T]
        logits = jnp.where(future, -jnp.inf, logits)
        # F.softmax(..., dim=1): normalize over query positions per key column.
        m = jnp.max(logits, axis=0, keepdims=True)
        e = jnp.exp(logits - m)
        probs = e * pl.reciprocal(jnp.sum(e, axis=0, keepdims=True), approx=True)
        h = mm(probs, v)                                    # [T, Cin]
        # TODO(synk): for large T, tile logits/probs over query blocks
        # (flash-style) to respect v7x's 64 MiB VMEM; not needed at T=16.

        # ---- num_sub_blocks x (dilated causal Conv1d -> ReLU) ----
        # Per-tap matmuls summed: out[t] = sum_j W_j @ h[t - (taps-1-j)*dil].
        for _ in range(n_convs):
            acc = None
            for j in range(taps):
                w_tap = p_refs[p + j][...]                  # [Cin_conv, Cout]
                contrib = mm(causal_shift(h, (taps - 1 - j) * dilation), w_tap)
                acc = contrib if acc is None else acc + contrib
            cb = p_refs[p + taps][...]                      # [1, Cout]
            p += taps + 1
            h = jnp.maximum(acc + cb, 0.0)

        # ---- residual (1x1 downsample when channels change) + final ReLU ----
        if has_down:
            dw = p_refs[p][...]; db = p_refs[p + 1][...]
            p += 2
            res = mm(x_b, dw) + db
        else:
            res = x
        x = jnp.maximum(h + res, 0.0)                       # relu(out + res)

    # final_conv: 1x1 Conv1d num_channels[-1] -> output_size
    fw = p_refs[p][...]; fb = p_refs[p + 1][...]
    out_ref[0] = mm(x, fw) + fb


# -----------------------------------------------------------------------------
# Wrapper (single pallas_call; only boundary transposes happen in XLA)
# -----------------------------------------------------------------------------

def tcanet_forward(x_nct, flat_params, *, level_meta, key_size, kernel_size):
    """TCANet.forward with temp_attn=True (eval mode). x_nct: [B, emb_size, T]."""
    B, C0, T = x_nct.shape
    x_btc = jnp.transpose(x_nct, (0, 2, 1)).astype(jnp.float32)   # NCT -> NTC
    out_size = flat_params[-1].shape[1]

    kern = functools.partial(_tcanet_fused_kernel, level_meta=level_meta,
                             key_size=key_size, taps=kernel_size, seq_len=T)

    in_specs = [pl.BlockSpec((1, T, C0), lambda b: (b, 0, 0))]
    for w in flat_params:
        # Weights are whole-array blocks; block index constant across the grid,
        # so they are fetched into VMEM once and reused for every batch step.
        in_specs.append(pl.BlockSpec(w.shape, lambda b: (0, 0)))

    y_btc = pl.pallas_call(
        kern,
        grid=(B,),
        in_specs=in_specs,
        out_specs=pl.BlockSpec((1, T, out_size), lambda b: (b, 0, 0)),
        out_shape=jax.ShapeDtypeStruct((B, T, out_size), jnp.float32),
        compiler_params=pltpu.CompilerParams(
            dimension_semantics=("parallel",)),
    )(x_btc, *flat_params)
    return jnp.transpose(y_btc, (0, 2, 1))                        # back to NCT


# -----------------------------------------------------------------------------
# Deterministic synthetic parameters, pre-packed for the fused kernel
# -----------------------------------------------------------------------------

def init_params(key, emb_size, output_size, num_channels, key_size,
                kernel_size, num_sub_blocks):
    """Packing (eval mode; weight_norm folded, dropout identity):
      * AttentionBlock Wq/Wk/Wv (+biases)  -> one [Cin, 2K+Cin] / [1, 2K+Cin]
      * each Conv1d weight [Cout, Cin, k]  -> k per-tap matrices [Cin, Cout]
      * downsample / final 1x1 Conv1d      -> plain [Cin, Cout]
    Returns (flat_params, level_meta) with level_meta static Python metadata.
    """
    # TODO(synk): `decoder` Linear exists in the module but is unused when
    # temp_attn=True, so it is not materialized here.
    keys = iter(jax.random.split(key, 512))

    def normal(shape, std):
        return std * jax.random.normal(next(keys), shape, dtype=jnp.float32)

    flat, meta = [], []
    c_in = emb_size
    for lvl, c_out in enumerate(num_channels):
        dilation = 2 ** lvl
        flat.append(normal((c_in, 2 * key_size + c_in), 0.05))   # Wq | Wk | Wv
        flat.append(normal((1, 2 * key_size + c_in), 0.05))      # bq | bk | bv
        conv_cin = c_in
        for _ in range(num_sub_blocks):
            for _tap in range(kernel_size):
                flat.append(normal((conv_cin, c_out), 0.01))     # conv tap w
            flat.append(normal((1, c_out), 0.01))                # conv b
            conv_cin = c_out
        has_down = c_in != c_out
        if has_down:
            flat.append(normal((c_in, c_out), 0.01))             # downsample w
            flat.append(normal((1, c_out), 0.01))                # downsample b
        meta.append((dilation, num_sub_blocks, has_down))
        c_in = c_out
    flat.append(normal((num_channels[-1], output_size), 0.01))   # final_conv w
    flat.append(normal((1, output_size), 0.01))                  # final_conv b
    return flat, tuple(meta)


if __name__ == "__main__":
    B, emb_size, T = 2, 8, 16
    output_size = 10
    num_channels = [16, 16, 16, 16]
    key_size = 12
    kernel_size = 2
    num_sub_blocks = 2

    root = jax.random.PRNGKey(0)
    pkey, xkey = jax.random.split(root)
    flat_params, level_meta = init_params(pkey, emb_size, output_size,
                                          num_channels, key_size, kernel_size,
                                          num_sub_blocks)
    x = jax.random.normal(xkey, (B, emb_size, T), dtype=jnp.float32)

    fwd = jax.jit(functools.partial(tcanet_forward, level_meta=level_meta,
                                    key_size=key_size, kernel_size=kernel_size))
    y = jax.block_until_ready(fwd(x, flat_params))
    assert y.shape == (B, output_size, T)
    assert bool(jnp.all(jnp.isfinite(y)))
    print("KERNEL_OK")
</pallas_src>

<mosaic_0001>
module attributes {stable_mosaic.version = 11 : i64} {
  func.func @_tcanet_fused_kernel(%arg0: i32, %arg1: memref<1x16x8xf32, #tpu.memory_space<vmem>>, %arg2: memref<8x32xf32, #tpu.memory_space<vmem>>, %arg3: memref<1x32xf32, #tpu.memory_space<vmem>>, %arg4: memref<8x16xf32, #tpu.memory_space<vmem>>, %arg5: memref<8x16xf32, #tpu.memory_space<vmem>>, %arg6: memref<1x16xf32, #tpu.memory_space<vmem>>, %arg7: memref<16x16xf32, #tpu.memory_space<vmem>>, %arg8: memref<16x16xf32, #tpu.memory_space<vmem>>, %arg9: memref<1x16xf32, #tpu.memory_space<vmem>>, %arg10: memref<8x16xf32, #tpu.memory_space<vmem>>, %arg11: memref<1x16xf32, #tpu.memory_space<vmem>>, %arg12: memref<16x40xf32, #tpu.memory_space<vmem>>, %arg13: memref<1x40xf32, #tpu.memory_space<vmem>>, %arg14: memref<16x16xf32, #tpu.memory_space<vmem>>, %arg15: memref<16x16xf32, #tpu.memory_space<vmem>>, %arg16: memref<1x16xf32, #tpu.memory_space<vmem>>, %arg17: memref<16x16xf32, #tpu.memory_space<vmem>>, %arg18: memref<16x16xf32, #tpu.memory_space<vmem>>, %arg19: memref<1x16xf32, #tpu.memory_space<vmem>>, %arg20: memref<16x40xf32, #tpu.memory_space<vmem>>, %arg21: memref<1x40xf32, #tpu.memory_space<vmem>>, %arg22: memref<16x16xf32, #tpu.memory_space<vmem>>, %arg23: memref<16x16xf32, #tpu.memory_space<vmem>>, %arg24: memref<1x16xf32, #tpu.memory_space<vmem>>, %arg25: memref<16x16xf32, #tpu.memory_space<vmem>>, %arg26: memref<16x16xf32, #tpu.memory_space<vmem>>, %arg27: memref<1x16xf32, #tpu.memory_space<vmem>>, %arg28: memref<16x40xf32, #tpu.memory_space<vmem>>, %arg29: memref<1x40xf32, #tpu.memory_space<vmem>>, %arg30: memref<16x16xf32, #tpu.memory_space<vmem>>, %arg31: memref<16x16xf32, #tpu.memory_space<vmem>>, %arg32: memref<1x16xf32, #tpu.memory_space<vmem>>, %arg33: memref<16x16xf32, #tpu.memory_space<vmem>>, %arg34: memref<16x16xf32, #tpu.memory_space<vmem>>, %arg35: memref<1x16xf32, #tpu.memory_space<vmem>>, %arg36: memref<16x10xf32, #tpu.memory_space<vmem>>, %arg37: memref<1x10xf32, #tpu.memory_space<vmem>>, %arg38: memref<1x16x10xf32, #tpu.memory_space<vmem>>) attributes {dimension_semantics = [#tpu.dimension_semantics<parallel>], iteration_bounds = array<i64: 2>, scalar_prefetch = 0 : i64, scratch_operands = 0 : i64, tpu.core_type = #tpu.core_type<tc>, window_params = [{transform_indices = @transform_0, window_bounds = array<i64: 1, 16, 8>}, {pipeline_mode = #tpu.pipeline_mode<synchronous>, transform_indices = @transform_1, window_bounds = array<i64: 8, 32>}, {pipeline_mode = #tpu.pipeline_mode<synchronous>, transform_indices = @transform_2, window_bounds = array<i64: 1, 32>}, {pipeline_mode = #tpu.pipeline_mode<synchronous>, transform_indices = @transform_3, window_bounds = array<i64: 8, 16>}, {pipeline_mode = #tpu.pipeline_mode<synchronous>, transform_indices = @transform_4, window_bounds = array<i64: 8, 16>}, {pipeline_mode = #tpu.pipeline_mode<synchronous>, transform_indices = @transform_5, window_bounds = array<i64: 1, 16>}, {pipeline_mode = #tpu.pipeline_mode<synchronous>, transform_indices = @transform_6, window_bounds = array<i64: 16, 16>}, {pipeline_mode = #tpu.pipeline_mode<synchronous>, transform_indices = @transform_7, window_bounds = array<i64: 16, 16>}, {pipeline_mode = #tpu.pipeline_mode<synchronous>, transform_indices = @transform_8, window_bounds = array<i64: 1, 16>}, {pipeline_mode = #tpu.pipeline_mode<synchronous>, transform_indices = @transform_9, window_bounds = array<i64: 8, 16>}, {pipeline_mode = #tpu.pipeline_mode<synchronous>, transform_indices = @transform_10, window_bounds = array<i64: 1, 16>}, {pipeline_mode = #tpu.pipeline_mode<synchronous>, transform_indices = @transform_11, window_bounds = array<i64: 16, 40>}, {pipeline_mode = #tpu.pipeline_mode<synchronous>, transform_indices = @transform_12, window_bounds = array<i64: 1, 40>}, {pipeline_mode = #tpu.pipeline_mode<synchronous>, transform_indices = @transform_13, window_bounds = array<i64: 16, 16>}, {pipeline_mode = #tpu.pipeline_mode<synchronous>, transform_indices = @transform_14, window_bounds = array<i64: 16, 16>}, {pipeline_mode = #tpu.pipeline_mode<synchronous>, transform_indices = @transform_15, window_bounds = array<i64: 1, 16>}, {pipeline_mode = #tpu.pipeline_mode<synchronous>, transform_indices = @transform_16, window_bounds = array<i64: 16, 16>}, {pipeline_mode = #tpu.pipeline_mode<synchronous>, transform_indices = @transform_17, window_bounds = array<i64: 16, 16>}, {pipeline_mode = #tpu.pipeline_mode<synchronous>, transform_indices = @transform_18, window_bounds = array<i64: 1, 16>}, {pipeline_mode = #tpu.pipeline_mode<synchronous>, transform_indices = @transform_19, window_bounds = array<i64: 16, 40>}, {pipeline_mode = #tpu.pipeline_mode<synchronous>, transform_indices = @transform_20, window_bounds = array<i64: 1, 40>}, {pipeline_mode = #tpu.pipeline_mode<synchronous>, transform_indices = @transform_21, window_bounds = array<i64: 16, 16>}, {pipeline_mode = #tpu.pipeline_mode<synchronous>, transform_indices = @transform_22, window_bounds = array<i64: 16, 16>}, {pipeline_mode = #tpu.pipeline_mode<synchronous>, transform_indices = @transform_23, window_bounds = array<i64: 1, 16>}, {pipeline_mode = #tpu.pipeline_mode<synchronous>, transform_indices = @transform_24, window_bounds = array<i64: 16, 16>}, {pipeline_mode = #tpu.pipeline_mode<synchronous>, transform_indices = @transform_25, window_bounds = array<i64: 16, 16>}, {pipeline_mode = #tpu.pipeline_mode<synchronous>, transform_indices = @transform_26, window_bounds = array<i64: 1, 16>}, {pipeline_mode = #tpu.pipeline_mode<synchronous>, transform_indices = @transform_27, window_bounds = array<i64: 16, 40>}, {pipeline_mode = #tpu.pipeline_mode<synchronous>, transform_indices = @transform_28, window_bounds = array<i64: 1, 40>}, {pipeline_mode = #tpu.pipeline_mode<synchronous>, transform_indices = @transform_29, window_bounds = array<i64: 16, 16>}, {pipeline_mode = #tpu.pipeline_mode<synchronous>, transform_indices = @transform_30, window_bounds = array<i64: 16, 16>}, {pipeline_mode = #tpu.pipeline_mode<synchronous>, transform_indices = @transform_31, window_bounds = array<i64: 1, 16>}, {pipeline_mode = #tpu.pipeline_mode<synchronous>, transform_indices = @transform_32, window_bounds = array<i64: 16, 16>}, {pipeline_mode = #tpu.pipeline_mode<synchronous>, transform_indices = @transform_33, window_bounds = array<i64: 16, 16>}, {pipeline_mode = #tpu.pipeline_mode<synchronous>, transform_indices = @transform_34, window_bounds = array<i64: 1, 16>}, {pipeline_mode = #tpu.pipeline_mode<synchronous>, transform_indices = @transform_35, window_bounds = array<i64: 16, 10>}, {pipeline_mode = #tpu.pipeline_mode<synchronous>, transform_indices = @transform_36, window_bounds = array<i64: 1, 10>}, {transform_indices = @transform_37, window_bounds = array<i64: 1, 16, 10>}]} {
    %0 = tpu.iota {dimensions = array<i32: 0>} : vector<16x16xi32>
    %1 = tpu.iota {dimensions = array<i32: 1>} : vector<16x16xi32>
    %2 = arith.cmpi sgt, %1, %0 : vector<16x16xi32>
    %c0 = arith.constant 0 : index
    %c0_0 = arith.constant 0 : index
    %c0_1 = arith.constant 0 : index
    %3 = vector.load %arg1[%c0, %c0_0, %c0_1] : memref<1x16x8xf32, #tpu.memory_space<vmem>>, vector<1x16x8xf32>
    %4 = vector.shape_cast %3 : vector<1x16x8xf32> to vector<16x8xf32>
    %c0_2 = arith.constant 0 : index
    %c0_3 = arith.constant 0 : index
    %5 = vector.load %arg2[%c0_2, %c0_3] : memref<8x32xf32, #tpu.memory_space<vmem>>, vector<8x32xf32>
    %c0_4 = arith.constant 0 : index
    %c0_5 = arith.constant 0 : index
    %6 = vector.load %arg3[%c0_4, %c0_5] : memref<1x32xf32, #tpu.memory_space<vmem>>, vector<1x32xf32>
    %7 = arith.truncf %4 : vector<16x8xf32> to vector<16x8xbf16>
    %8 = arith.truncf %5 : vector<8x32xf32> to vector<8x32xbf16>
    %cst = arith.constant dense<0.000000e+00> : vector<16x32xf32>
    %9 = tpu.matmul %7, %8, %cst {dimension_numbers = #tpu.dot_dimension_numbers<[1], [0], [0], [1], [0, 0, 1, 1], [], []>} : vector<16x8xbf16>, vector<8x32xbf16>, vector<16x32xf32> -> vector<16x32xf32>
    %10 = vector.broadcast %6 : vector<1x32xf32> to vector<16x32xf32>
    %11 = arith.addf %9, %10 : vector<16x32xf32>
    %12 = vector.extract_strided_slice %11 {offsets = [0, 0], sizes = [16, 12], strides = [1, 1]} : vector<16x32xf32> to vector<16x12xf32>
    %13 = vector.extract_strided_slice %11 {offsets = [0, 12], sizes = [16, 12], strides = [1, 1]} : vector<16x32xf32> to vector<16x12xf32>
    %14 = vector.extract_strided_slice %11 {offsets = [0, 24], sizes = [16, 8], strides = [1, 1]} : vector<16x32xf32> to vector<16x8xf32>
    %15 = tpu.transpose %13, [1, 0] : vector<16x12xf32> -> vector<12x16xf32>
    %16 = arith.truncf %12 : vector<16x12xf32> to vector<16x12xbf16>
    %17 = arith.truncf %15 : vector<12x16xf32> to vector<12x16xbf16>
    %cst_6 = arith.constant dense<0.000000e+00> : vector<16x16xf32>
    %18 = tpu.matmul %16, %17, %cst_6 {dimension_numbers = #tpu.dot_dimension_numbers<[1], [0], [0], [1], [0, 0, 1, 1], [], []>} : vector<16x12xbf16>, vector<12x16xbf16>, vector<16x16xf32> -> vector<16x16xf32>
    %cst_7 = arith.constant 0.288675129 : f32
    %19 = vector.broadcast %cst_7 : f32 to vector<16x16xf32>
    %20 = arith.mulf %18, %19 : vector<16x16xf32>
    %cst_8 = arith.constant 0xFF800000 : f32
    %21 = vector.broadcast %cst_8 : f32 to vector<16x16xf32>
    %22 = arith.select %2, %21, %20 : vector<16x16xi1>, vector<16x16xf32>
    %cst_9 = arith.constant dense<0xFF800000> : vector<16xf32>
    %23 = vector.multi_reduction <maximumf>, %22, %cst_9 [0] : vector<16x16xf32> to vector<16xf32>
    %24 = vector.shape_cast %23 : vector<16xf32> to vector<1x16xf32>
    %25 = vector.broadcast %24 : vector<1x16xf32> to vector<16x16xf32>
    %26 = arith.subf %22, %25 : vector<16x16xf32>
    %27 = math.exp %26 : vector<16x16xf32>
    %cst_10 = arith.constant dense<0.000000e+00> : vector<16xf32>
    %28 = vector.multi_reduction <add>, %27, %cst_10 [0] : vector<16x16xf32> to vector<16xf32>
    %29 = vector.shape_cast %28 : vector<16xf32> to vector<1x16xf32>
    %30 = tpu.reciprocal %29 {approx = true} : vector<1x16xf32> -> vector<1x16xf32>
    %31 = vector.broadcast %30 : vector<1x16xf32> to vector<16x16xf32>
    %32 = arith.mulf %27, %31 : vector<16x16xf32>
    %33 = arith.truncf %32 : vector<16x16xf32> to vector<16x16xbf16>
    %34 = arith.truncf %14 : vector<16x8xf32> to vector<16x8xbf16>
    %cst_11 = arith.constant dense<0.000000e+00> : vector<16x8xf32>
    %35 = tpu.matmul %33, %34, %cst_11 {dimension_numbers = #tpu.dot_dimension_numbers<[1], [0], [0], [1], [0, 0, 1, 1], [], []>} : vector<16x16xbf16>, vector<16x8xbf16>, vector<16x8xf32> -> vector<16x8xf32>
    %c0_12 = arith.constant 0 : index
    %c0_13 = arith.constant 0 : index
    %36 = vector.load %arg4[%c0_12, %c0_13] : memref<8x16xf32, #tpu.memory_space<vmem>>, vector<8x16xf32>
    %cst_14 = arith.constant 0.000000e+00 : f32
    %37 = vector.broadcast %cst_14 : f32 to vector<1x8xf32>
    %38 = vector.extract_strided_slice %35 {offsets = [0, 0], sizes = [15, 8], strides = [1, 1]} : vector<16x8xf32> to vector<15x8xf32>
    %39 = tpu.concatenate %37, %38 in 0 : vector<1x8xf32>, vector<15x8xf32> -> vector<16x8xf32>
    %40 = arith.truncf %39 : vector<16x8xf32> to vector<16x8xbf16>
    %41 = arith.truncf %36 : vector<8x16xf32> to vector<8x16xbf16>
    %cst_15 = arith.constant dense<0.000000e+00> : vector<16x16xf32>
    %42 = tpu.matmul %40, %41, %cst_15 {dimension_numbers = #tpu.dot_dimension_numbers<[1], [0], [0], [1], [0, 0, 1, 1], [], []>} : vector<16x8xbf16>, vector<8x16xbf16>, vector<16x16xf32> -> vector<16x16xf32>
    %c0_16 = arith.constant 0 : index
    %c0_17 = arith.constant 0 : index
    %43 = vector.load %arg5[%c0_16, %c0_17] : memref<8x16xf32, #tpu.memory_space<vmem>>, vector<8x16xf32>
    %44 = arith.truncf %35 : vector<16x8xf32> to vector<16x8xbf16>
    %45 = arith.truncf %43 : vector<8x16xf32> to vector<8x16xbf16>
    %cst_18 = arith.constant dense<0.000000e+00> : vector<16x16xf32>
    %46 = tpu.matmul %44, %45, %cst_18 {dimension_numbers = #tpu.dot_dimension_numbers<[1], [0], [0], [1], [0, 0, 1, 1], [], []>} : vector<16x8xbf16>, vector<8x16xbf16>, vector<16x16xf32> -> vector<16x16xf32>
    %47 = arith.addf %42, %46 : vector<16x16xf32>
    %c0_19 = arith.constant 0 : index
    %c0_20 = arith.constant 0 : index
    %48 = vector.load %arg6[%c0_19, %c0_20] : memref<1x16xf32, #tpu.memory_space<vmem>>, vector<1x16xf32>
    %49 = vector.broadcast %48 : vector<1x16xf32> to vector<16x16xf32>
    %50 = arith.addf %47, %49 : vector<16x16xf32>
    %cst_21 = arith.constant 0.000000e+00 : f32
    %51 = vector.broadcast %cst_21 : f32 to vector<16x16xf32>
    %52 = arith.maximumf %50, %51 : vector<16x16xf32>
    %c0_22 = arith.constant 0 : index
    %c0_23 = arith.constant 0 : index
    %53 = vector.load %arg7[%c0_22, %c0_23] : memref<16x16xf32, #tpu.memory_space<vmem>>, vector<16x16xf32>
    %cst_24 = arith.constant 0.000000e+00 : f32
    %54 = vector.broadcast %cst_24 : f32 to vector<1x16xf32>
    %55 = vector.extract_strided_slice %52 {offsets = [0, 0], sizes = [15, 16], strides = [1, 1]} : vector<16x16xf32> to vector<15x16xf32>
    %56 = tpu.concatenate %54, %55 in 0 : vector<1x16xf32>, vector<15x16xf32> -> vector<16x16xf32>
    %57 = arith.truncf %56 : vector<16x16xf32> to vector<16x16xbf16>
    %58 = arith.truncf %53 : vector<16x16xf32> to vector<16x16xbf16>
    %cst_25 = arith.constant dense<0.000000e+00> : vector<16x16xf32>
    %59 = tpu.matmul %57, %58, %cst_25 {dimension_numbers = #tpu.dot_dimension_numbers<[1], [0], [0], [1], [0, 0, 1, 1], [], []>} : vector<16x16xbf16>, vector<16x16xbf16>, vector<16x16xf32> -> vector<16x16xf32>
    %c0_26 = arith.constant 0 : index
    %c0_27 = arith.constant 0 : index
    %60 = vector.load %arg8[%c0_26, %c0_27] : memref<16x16xf32, #tpu.memory_space<vmem>>, vector<16x16xf32>
    %61 = arith.truncf %52 : vector<16x16xf32> to vector<16x16xbf16>
    %62 = arith.truncf %60 : vector<16x16xf32> to vector<16x16xbf16>
    %cst_28 = arith.constant dense<0.000000e+00> : vector<16x16xf32>
    %63 = tpu.matmul %61, %62, %cst_28 {dimension_numbers = #tpu.dot_dimension_numbers<[1], [0], [0], [1], [0, 0, 1, 1], [], []>} : vector<16x16xbf16>, vector<16x16xbf16>, vector<16x16xf32> -> vector<16x16xf32>
    %64 = arith.addf %59, %63 : vector<16x16xf32>
    %c0_29 = arith.constant 0 : index
    %c0_30 = arith.constant 0 : index
    %65 = vector.load %arg9[%c0_29, %c0_30] : memref<1x16xf32, #tpu.memory_space<vmem>>, vector<1x16xf32>
    %66 = vector.broadcast %65 : vector<1x16xf32> to vector<16x16xf32>
    %67 = arith.addf %64, %66 : vector<16x16xf32>
    %cst_31 = arith.constant 0.000000e+00 : f32
    %68 = vector.broadcast %cst_31 : f32 to vector<16x16xf32>
    %69 = arith.maximumf %67, %68 : vector<16x16xf32>
    %c0_32 = arith.constant 0 : index
    %c0_33 = arith.constant 0 : index
    %70 = vector.load %arg10[%c0_32, %c0_33] : memref<8x16xf32, #tpu.memory_space<vmem>>, vector<8x16xf32>
    %c0_34 = arith.constant 0 : index
    %c0_35 = arith.constant 0 : index
    %71 = vector.load %arg11[%c0_34, %c0_35] : memref<1x16xf32, #tpu.memory_space<vmem>>, vector<1x16xf32>
    %72 = arith.truncf %70 : vector<8x16xf32> to vector<8x16xbf16>
    %cst_36 = arith.constant dense<0.000000e+00> : vector<16x16xf32>
    %73 = tpu.matmul %7, %72, %cst_36 {dimension_numbers = #tpu.dot_dimension_numbers<[1], [0], [0], [1], [0, 0, 1, 1], [], []>} : vector<16x8xbf16>, vector<8x16xbf16>, vector<16x16xf32> -> vector<16x16xf32>
    %74 = vector.broadcast %71 : vector<1x16xf32> to vector<16x16xf32>
    %75 = arith.addf %73, %74 : vector<16x16xf32>
    %76 = arith.addf %69, %75 : vector<16x16xf32>
    %cst_37 = arith.constant 0.000000e+00 : f32
    %77 = vector.broadcast %cst_37 : f32 to vector<16x16xf32>
    %78 = arith.maximumf %76, %77 : vector<16x16xf32>
    %c0_38 = arith.constant 0 : index
    %c0_39 = arith.constant 0 : index
    %79 = vector.load %arg12[%c0_38, %c0_39] : memref<16x40xf32, #tpu.memory_space<vmem>>, vector<16x40xf32>
    %c0_40 = arith.constant 0 : index
    %c0_41 = arith.constant 0 : index
    %80 = vector.load %arg13[%c0_40, %c0_41] : memref<1x40xf32, #tpu.memory_space<vmem>>, vector<1x40xf32>
    %81 = arith.truncf %78 : vector<16x16xf32> to vector<16x16xbf16>
    %82 = arith.truncf %79 : vector<16x40xf32> to vector<16x40xbf16>
    %cst_42 = arith.constant dense<0.000000e+00> : vector<16x40xf32>
    %83 = tpu.matmul %81, %82, %cst_42 {dimension_numbers = #tpu.dot_dimension_numbers<[1], [0], [0], [1], [0, 0, 1, 1], [], []>} : vector<16x16xbf16>, vector<16x40xbf16>, vector<16x40xf32> -> vector<16x40xf32>
    %84 = vector.broadcast %80 : vector<1x40xf32> to vector<16x40xf32>
    %85 = arith.addf %83, %84 : vector<16x40xf32>
    %86 = vector.extract_strided_slice %85 {offsets = [0, 0], sizes = [16, 12], strides = [1, 1]} : vector<16x40xf32> to vector<16x12xf32>
    %87 = vector.extract_strided_slice %85 {offsets = [0, 12], sizes = [16, 12], strides = [1, 1]} : vector<16x40xf32> to vector<16x12xf32>
    %88 = vector.extract_strided_slice %85 {offsets = [0, 24], sizes = [16, 16], strides = [1, 1]} : vector<16x40xf32> to vector<16x16xf32>
    %89 = tpu.transpose %87, [1, 0] : vector<16x12xf32> -> vector<12x16xf32>
    %90 = arith.truncf %86 : vector<16x12xf32> to vector<16x12xbf16>
    %91 = arith.truncf %89 : vector<12x16xf32> to vector<12x16xbf16>
    %cst_43 = arith.constant dense<0.000000e+00> : vector<16x16xf32>
    %92 = tpu.matmul %90, %91, %cst_43 {dimension_numbers = #tpu.dot_dimension_numbers<[1], [0], [0], [1], [0, 0, 1, 1], [], []>} : vector<16x12xbf16>, vector<12x16xbf16>, vector<16x16xf32> -> vector<16x16xf32>
    %cst_44 = arith.constant 0.288675129 : f32
    %93 = vector.broadcast %cst_44 : f32 to vector<16x16xf32>
    %94 = arith.mulf %92, %93 : vector<16x16xf32>
    %cst_45 = arith.constant 0xFF800000 : f32
    %95 = vector.broadcast %cst_45 : f32 to vector<16x16xf32>
    %96 = arith.select %2, %95, %94 : vector<16x16xi1>, vector<16x16xf32>
    %cst_46 = arith.constant dense<0xFF800000> : vector<16xf32>
    %97 = vector.multi_reduction <maximumf>, %96, %cst_46 [0] : vector<16x16xf32> to vector<16xf32>
    %98 = vector.shape_cast %97 : vector<16xf32> to vector<1x16xf32>
    %99 = vector.broadcast %98 : vector<1x16xf32> to vector<16x16xf32>
    %100 = arith.subf %96, %99 : vector<16x16xf32>
    %101 = math.exp %100 : vector<16x16xf32>
    %cst_47 = arith.constant dense<0.000000e+00> : vector<16xf32>
    %102 = vector.multi_reduction <add>, %101, %cst_47 [0] : vector<16x16xf32> to vector<16xf32>
    %103 = vector.shape_cast %102 : vector<16xf32> to vector<1x16xf32>
    %104 = tpu.reciprocal %103 {approx = true} : vector<1x16xf32> -> vector<1x16xf32>
    %105 = vector.broadcast %104 : vector<1x16xf32> to vector<16x16xf32>
    %106 = arith.mulf %101, %105 : vector<16x16xf32>
    %107 = arith.truncf %106 : vector<16x16xf32> to vector<16x16xbf16>
    %108 = arith.truncf %88 : vector<16x16xf32> to vector<16x16xbf16>
    %cst_48 = arith.constant dense<0.000000e+00> : vector<16x16xf32>
    %109 = tpu.matmul %107, %108, %cst_48 {dimension_numbers = #tpu.dot_dimension_numbers<[1], [0], [0], [1], [0, 0, 1, 1], [], []>} : vector<16x16xbf16>, vector<16x16xbf16>, vector<16x16xf32> -> vector<16x16xf32>
    %c0_49 = arith.constant 0 : index
    %c0_50 = arith.constant 0 : index
    %110 = vector.load %arg14[%c0_49, %c0_50] : memref<16x16xf32, #tpu.memory_space<vmem>>, vector<16x16xf32>
    %cst_51 = arith.constant 0.000000e+00 : f32
    %111 = vector.broadcast %cst_51 : f32 to vector<2x16xf32>
    %112 = vector.extract_strided_slice %109 {offsets = [0, 0], sizes = [14, 16], strides = [1, 1]} : vector<16x16xf32> to vector<14x16xf32>
    %113 = tpu.concatenate %111, %112 in 0 : vector<2x16xf32>, vector<14x16xf32> -> vector<16x16xf32>
    %114 = arith.truncf %113 : vector<16x16xf32> to vector<16x16xbf16>
    %115 = arith.truncf %110 : vector<16x16xf32> to vector<16x16xbf16>
    %cst_52 = arith.constant dense<0.000000e+00> : vector<16x16xf32>
    %116 = tpu.matmul %114, %115, %cst_52 {dimension_numbers = #tpu.dot_dimension_numbers<[1], [0], [0], [1], [0, 0, 1, 1], [], []>} : vector<16x16xbf16>, vector<16x16xbf16>, vector<16x16xf32> -> vector<16x16xf32>
    %c0_53 = arith.constant 0 : index
    %c0_54 = arith.constant 0 : index
    %117 = vector.load %arg15[%c0_53, %c0_54] : memref<16x16xf32, #tpu.memory_space<vmem>>, vector<16x16xf32>
    %118 = arith.truncf %109 : vector<16x16xf32> to vector<16x16xbf16>
    %119 = arith.truncf %117 : vector<16x16xf32> to vector<16x16xbf16>
    %cst_55 = arith.constant dense<0.000000e+00> : vector<16x16xf32>
    %120 = tpu.matmul %118, %119, %cst_55 {dimension_numbers = #tpu.dot_dimension_numbers<[1], [0], [0], [1], [0, 0, 1, 1], [], []>} : vector<16x16xbf16>, vector<16x16xbf16>, vector<16x16xf32> -> vector<16x16xf32>
    %121 = arith.addf %116, %120 : vector<16x16xf32>
    %c0_56 = arith.constant 0 : index
    %c0_57 = arith.constant 0 : index
    %122 = vector.load %arg16[%c0_56, %c0_57] : memref<1x16xf32, #tpu.memory_space<vmem>>, vector<1x16xf32>
    %123 = vector.broadcast %122 : vector<1x16xf32> to vector<16x16xf32>
    %124 = arith.addf %121, %123 : vector<16x16xf32>
    %cst_58 = arith.constant 0.000000e+00 : f32
    %125 = vector.broadcast %cst_58 : f32 to vector<16x16xf32>
    %126 = arith.maximumf %124, %125 : vector<16x16xf32>
    %c0_59 = arith.constant 0 : index
    %c0_60 = arith.constant 0 : index
    %127 = vector.load %arg17[%c0_59, %c0_60] : memref<16x16xf32, #tpu.memory_space<vmem>>, vector<16x16xf32>
    %cst_61 = arith.constant 0.000000e+00 : f32
    %128 = vector.broadcast %cst_61 : f32 to vector<2x16xf32>
    %129 = vector.extract_strided_slice %126 {offsets = [0, 0], sizes = [14, 16], strides = [1, 1]} : vector<16x16xf32> to vector<14x16xf32>
    %130 = tpu.concatenate %128, %129 in 0 : vector<2x16xf32>, vector<14x16xf32> -> vector<16x16xf32>
    %131 = arith.truncf %130 : vector<16x16xf32> to vector<16x16xbf16>
    %132 = arith.truncf %127 : vector<16x16xf32> to vector<16x16xbf16>
    %cst_62 = arith.constant dense<0.000000e+00> : vector<16x16xf32>
    %133 = tpu.matmul %131, %132, %cst_62 {dimension_numbers = #tpu.dot_dimension_numbers<[1], [0], [0], [1], [0, 0, 1, 1], [], []>} : vector<16x16xbf16>, vector<16x16xbf16>, vector<16x16xf32> -> vector<16x16xf32>
    %c0_63 = arith.constant 0 : index
    %c0_64 = arith.constant 0 : index
    %134 = vector.load %arg18[%c0_63, %c0_64] : memref<16x16xf32, #tpu.memory_space<vmem>>, vector<16x16xf32>
    %135 = arith.truncf %126 : vector<16x16xf32> to vector<16x16xbf16>
    %136 = arith.truncf %134 : vector<16x16xf32> to vector<16x16xbf16>
    %cst_65 = arith.constant dense<0.000000e+00> : vector<16x16xf32>
    %137 = tpu.matmul %135, %136, %cst_65 {dimension_numbers = #tpu.dot_dimension_numbers<[1], [0], [0], [1], [0, 0, 1, 1], [], []>} : vector<16x16xbf16>, vector<16x16xbf16>, vector<16x16xf32> -> vector<16x16xf32>
    %138 = arith.addf %133, %137 : vector<16x16xf32>
    %c0_66 = arith.constant 0 : index
    %c0_67 = arith.constant 0 : index
    %139 = vector.load %arg19[%c0_66, %c0_67] : memref<1x16xf32, #tpu.memory_space<vmem>>, vector<1x16xf32>
    %140 = vector.broadcast %139 : vector<1x16xf32> to vector<16x16xf32>
    %141 = arith.addf %138, %140 : vector<16x16xf32>
    %cst_68 = arith.constant 0.000000e+00 : f32
    %142 = vector.broadcast %cst_68 : f32 to vector<16x16xf32>
    %143 = arith.maximumf %141, %142 : vector<16x16xf32>
    %144 = arith.addf %143, %78 : vector<16x16xf32>
    %cst_69 = arith.constant 0.000000e+00 : f32
    %145 = vector.broadcast %cst_69 : f32 to vector<16x16xf32>
    %146 = arith.maximumf %144, %145 : vector<16x16xf32>
    %c0_70 = arith.constant 0 : index
    %c0_71 = arith.constant 0 : index
    %147 = vector.load %arg20[%c0_70, %c0_71] : memref<16x40xf32, #tpu.memory_space<vmem>>, vector<16x40xf32>
    %c0_72 = arith.constant 0 : index
    %c0_73 = arith.constant 0 : index
    %148 = vector.load %arg21[%c0_72, %c0_73] : memref<1x40xf32, #tpu.memory_space<vmem>>, vector<1x40xf32>
    %149 = arith.truncf %146 : vector<16x16xf32> to vector<16x16xbf16>
    %150 = arith.truncf %147 : vector<16x40xf32> to vector<16x40xbf16>
    %cst_74 = arith.constant dense<0.000000e+00> : vector<16x40xf32>
    %151 = tpu.matmul %149, %150, %cst_74 {dimension_numbers = #tpu.dot_dimension_numbers<[1], [0], [0], [1], [0, 0, 1, 1], [], []>} : vector<16x16xbf16>, vector<16x40xbf16>, vector<16x40xf32> -> vector<16x40xf32>
    %152 = vector.broadcast %148 : vector<1x40xf32> to vector<16x40xf32>
    %153 = arith.addf %151, %152 : vector<16x40xf32>
    %154 = vector.extract_strided_slice %153 {offsets = [0, 0], sizes = [16, 12], strides = [1, 1]} : vector<16x40xf32> to vector<16x12xf32>
    %155 = vector.extract_strided_slice %153 {offsets = [0, 12], sizes = [16, 12], strides = [1, 1]} : vector<16x40xf32> to vector<16x12xf32>
    %156 = vector.extract_strided_slice %153 {offsets = [0, 24], sizes = [16, 16], strides = [1, 1]} : vector<16x40xf32> to vector<16x16xf32>
    %157 = tpu.transpose %155, [1, 0] : vector<16x12xf32> -> vector<12x16xf32>
    %158 = arith.truncf %154 : vector<16x12xf32> to vector<16x12xbf16>
    %159 = arith.truncf %157 : vector<12x16xf32> to vector<12x16xbf16>
    %cst_75 = arith.constant dense<0.000000e+00> : vector<16x16xf32>
    %160 = tpu.matmul %158, %159, %cst_75 {dimension_numbers = #tpu.dot_dimension_numbers<[1], [0], [0], [1], [0, 0, 1, 1], [], []>} : vector<16x12xbf16>, vector<12x16xbf16>, vector<16x16xf32> -> vector<16x16xf32>
    %cst_76 = arith.constant 0.288675129 : f32
    %161 = vector.broadcast %cst_76 : f32 to vector<16x16xf32>
    %162 = arith.mulf %160, %161 : vector<16x16xf32>
    %cst_77 = arith.constant 0xFF800000 : f32
    %163 = vector.broadcast %cst_77 : f32 to vector<16x16xf32>
    %164 = arith.select %2, %163, %162 : vector<16x16xi1>, vector<16x16xf32>
    %cst_78 = arith.constant dense<0xFF800000> : vector<16xf32>
    %165 = vector.multi_reduction <maximumf>, %164, %cst_78 [0] : vector<16x16xf32> to vector<16xf32>
    %166 = vector.shape_cast %165 : vector<16xf32> to vector<1x16xf32>
    %167 = vector.broadcast %166 : vector<1x16xf32> to vector<16x16xf32>
    %168 = arith.subf %164, %167 : vector<16x16xf32>
    %169 = math.exp %168 : vector<16x16xf32>
    %cst_79 = arith.constant dense<0.000000e+00> : vector<16xf32>
    %170 = vector.multi_reduction <add>, %169, %cst_79 [0] : vector<16x16xf32> to vector<16xf32>
    %171 = vector.shape_cast %170 : vector<16xf32> to vector<1x16xf32>
    %172 = tpu.reciprocal %171 {approx = true} : vector<1x16xf32> -> vector<1x16xf32>
    %173 = vector.broadcast %172 : vector<1x16xf32> to vector<16x16xf32>
    %174 = arith.mulf %169, %173 : vector<16x16xf32>
    %175 = arith.truncf %174 : vector<16x16xf32> to vector<16x16xbf16>
    %176 = arith.truncf %156 : vector<16x16xf32> to vector<16x16xbf16>
    %cst_80 = arith.constant dense<0.000000e+00> : vector<16x16xf32>
    %177 = tpu.matmul %175, %176, %cst_80 {dimension_numbers = #tpu.dot_dimension_numbers<[1], [0], [0], [1], [0, 0, 1, 1], [], []>} : vector<16x16xbf16>, vector<16x16xbf16>, vector<16x16xf32> -> vector<16x16xf32>
    %c0_81 = arith.constant 0 : index
    %c0_82 = arith.constant 0 : index
    %178 = vector.load %arg22[%c0_81, %c0_82] : memref<16x16xf32, #tpu.memory_space<vmem>>, vector<16x16xf32>
    %cst_83 = arith.constant 0.000000e+00 : f32
    %179 = vector.broadcast %cst_83 : f32 to vector<4x16xf32>
    %180 = vector.extract_strided_slice %177 {offsets = [0, 0], sizes = [12, 16], strides = [1, 1]} : vector<16x16xf32> to vector<12x16xf32>
    %181 = tpu.concatenate %179, %180 in 0 : vector<4x16xf32>, vector<12x16xf32> -> vector<16x16xf32>
    %182 = arith.truncf %181 : vector<16x16xf32> to vector<16x16xbf16>
    %183 = arith.truncf %178 : vector<16x16xf32> to vector<16x16xbf16>
    %cst_84 = arith.constant dense<0.000000e+00> : vector<16x16xf32>
    %184 = tpu.matmul %182, %183, %cst_84 {dimension_numbers = #tpu.dot_dimension_numbers<[1], [0], [0], [1], [0, 0, 1, 1], [], []>} : vector<16x16xbf16>, vector<16x16xbf16>, vector<16x16xf32> -> vector<16x16xf32>
    %c0_85 = arith.constant 0 : index
    %c0_86 = arith.constant 0 : index
    %185 = vector.load %arg23[%c0_85, %c0_86] : memref<16x16xf32, #tpu.memory_space<vmem>>, vector<16x16xf32>
    %186 = arith.truncf %177 : vector<16x16xf32> to vector<16x16xbf16>
    %187 = arith.truncf %185 : vector<16x16xf32> to vector<16x16xbf16>
    %cst_87 = arith.constant dense<0.000000e+00> : vector<16x16xf32>
    %188 = tpu.matmul %186, %187, %cst_87 {dimension_numbers = #tpu.dot_dimension_numbers<[1], [0], [0], [1], [0, 0, 1, 1], [], []>} : vector<16x16xbf16>, vector<16x16xbf16>, vector<16x16xf32> -> vector<16x16xf32>
    %189 = arith.addf %184, %188 : vector<16x16xf32>
    %c0_88 = arith.constant 0 : index
    %c0_89 = arith.constant 0 : index
    %190 = vector.load %arg24[%c0_88, %c0_89] : memref<1x16xf32, #tpu.memory_space<vmem>>, vector<1x16xf32>
    %191 = vector.broadcast %190 : vector<1x16xf32> to vector<16x16xf32>
    %192 = arith.addf %189, %191 : vector<16x16xf32>
    %cst_90 = arith.constant 0.000000e+00 : f32
    %193 = vector.broadcast %cst_90 : f32 to vector<16x16xf32>
    %194 = arith.maximumf %192, %193 : vector<16x16xf32>
    %c0_91 = arith.constant 0 : index
    %c0_92 = arith.constant 0 : index
    %195 = vector.load %arg25[%c0_91, %c0_92] : memref<16x16xf32, #tpu.memory_space<vmem>>, vector<16x16xf32>
    %cst_93 = arith.constant 0.000000e+00 : f32
    %196 = vector.broadcast %cst_93 : f32 to vector<4x16xf32>
    %197 = vector.extract_strided_slice %194 {offsets = [0, 0], sizes = [12, 16], strides = [1, 1]} : vector<16x16xf32> to vector<12x16xf32>
    %198 = tpu.concatenate %196, %197 in 0 : vector<4x16xf32>, vector<12x16xf32> -> vector<16x16xf32>
    %199 = arith.truncf %198 : vector<16x16xf32> to vector<16x16xbf16>
    %200 = arith.truncf %195 : vector<16x16xf32> to vector<16x16xbf16>
    %cst_94 = arith.constant dense<0.000000e+00> : vector<16x16xf32>
    %201 = tpu.matmul %199, %200, %cst_94 {dimension_numbers = #tpu.dot_dimension_numbers<[1], [0], [0], [1], [0, 0, 1, 1], [], []>} : vector<16x16xbf16>, vector<16x16xbf16>, vector<16x16xf32> -> vector<16x16xf32>
    %c0_95 = arith.constant 0 : index
    %c0_96 = arith.constant 0 : index
    %202 = vector.load %arg26[%c0_95, %c0_96] : memref<16x16xf32, #tpu.memory_space<vmem>>, vector<16x16xf32>
    %203 = arith.truncf %194 : vector<16x16xf32> to vector<16x16xbf16>
    %204 = arith.truncf %202 : vector<16x16xf32> to vector<16x16xbf16>
    %cst_97 = arith.constant dense<0.000000e+00> : vector<16x16xf32>
    %205 = tpu.matmul %203, %204, %cst_97 {dimension_numbers = #tpu.dot_dimension_numbers<[1], [0], [0], [1], [0, 0, 1, 1], [], []>} : vector<16x16xbf16>, vector<16x16xbf16>, vector<16x16xf32> -> vector<16x16xf32>
    %206 = arith.addf %201, %205 : vector<16x16xf32>
    %c0_98 = arith.constant 0 : index
    %c0_99 = arith.constant 0 : index
    %207 = vector.load %arg27[%c0_98, %c0_99] : memref<1x16xf32, #tpu.memory_space<vmem>>, vector<1x16xf32>
    %208 = vector.broadcast %207 : vector<1x16xf32> to vector<16x16xf32>
    %209 = arith.addf %206, %208 : vector<16x16xf32>
    %cst_100 = arith.constant 0.000000e+00 : f32
    %210 = vector.broadcast %cst_100 : f32 to vector<16x16xf32>
    %211 = arith.maximumf %209, %210 : vector<16x16xf32>
    %212 = arith.addf %211, %146 : vector<16x16xf32>
    %cst_101 = arith.constant 0.000000e+00 : f32
    %213 = vector.broadcast %cst_101 : f32 to vector<16x16xf32>
    %214 = arith.maximumf %212, %213 : vector<16x16xf32>
    %c0_102 = arith.constant 0 : index
    %c0_103 = arith.constant 0 : index
    %215 = vector.load %arg28[%c0_102, %c0_103] : memref<16x40xf32, #tpu.memory_space<vmem>>, vector<16x40xf32>
    %c0_104 = arith.constant 0 : index
    %c0_105 = arith.constant 0 : index
    %216 = vector.load %arg29[%c0_104, %c0_105] : memref<1x40xf32, #tpu.memory_space<vmem>>, vector<1x40xf32>
    %217 = arith.truncf %214 : vector<16x16xf32> to vector<16x16xbf16>
    %218 = arith.truncf %215 : vector<16x40xf32> to vector<16x40xbf16>
    %cst_106 = arith.constant dense<0.000000e+00> : vector<16x40xf32>
    %219 = tpu.matmul %217, %218, %cst_106 {dimension_numbers = #tpu.dot_dimension_numbers<[1], [0], [0], [1], [0, 0, 1, 1], [], []>} : vector<16x16xbf16>, vector<16x40xbf16>, vector<16x40xf32> -> vector<16x40xf32>
    %220 = vector.broadcast %216 : vector<1x40xf32> to vector<16x40xf32>
    %221 = arith.addf %219, %220 : vector<16x40xf32>
    %222 = vector.extract_strided_slice %221 {offsets = [0, 0], sizes = [16, 12], strides = [1, 1]} : vector<16x40xf32> to vector<16x12xf32>
    %223 = vector.extract_strided_slice %221 {offsets = [0, 12], sizes = [16, 12], strides = [1, 1]} : vector<16x40xf32> to vector<16x12xf32>
    %224 = vector.extract_strided_slice %221 {offsets = [0, 24], sizes = [16, 16], strides = [1, 1]} : vector<16x40xf32> to vector<16x16xf32>
    %225 = tpu.transpose %223, [1, 0] : vector<16x12xf32> -> vector<12x16xf32>
    %226 = arith.truncf %222 : vector<16x12xf32> to vector<16x12xbf16>
    %227 = arith.truncf %225 : vector<12x16xf32> to vector<12x16xbf16>
    %cst_107 = arith.constant dense<0.000000e+00> : vector<16x16xf32>
    %228 = tpu.matmul %226, %227, %cst_107 {dimension_numbers = #tpu.dot_dimension_numbers<[1], [0], [0], [1], [0, 0, 1, 1], [], []>} : vector<16x12xbf16>, vector<12x16xbf16>, vector<16x16xf32> -> vector<16x16xf32>
    %cst_108 = arith.constant 0.288675129 : f32
    %229 = vector.broadcast %cst_108 : f32 to vector<16x16xf32>
    %230 = arith.mulf %228, %229 : vector<16x16xf32>
    %cst_109 = arith.constant 0xFF800000 : f32
    %231 = vector.broadcast %cst_109 : f32 to vector<16x16xf32>
    %232 = arith.select %2, %231, %230 : vector<16x16xi1>, vector<16x16xf32>
    %cst_110 = arith.constant dense<0xFF800000> : vector<16xf32>
    %233 = vector.multi_reduction <maximumf>, %232, %cst_110 [0] : vector<16x16xf32> to vector<16xf32>
    %234 = vector.shape_cast %233 : vector<16xf32> to vector<1x16xf32>
    %235 = vector.broadcast %234 : vector<1x16xf32> to vector<16x16xf32>
    %236 = arith.subf %232, %235 : vector<16x16xf32>
    %237 = math.exp %236 : vector<16x16xf32>
    %cst_111 = arith.constant dense<0.000000e+00> : vector<16xf32>
    %238 = vector.multi_reduction <add>, %237, %cst_111 [0] : vector<16x16xf32> to vector<16xf32>
    %239 = vector.shape_cast %238 : vector<16xf32> to vector<1x16xf32>
    %240 = tpu.reciprocal %239 {approx = true} : vector<1x16xf32> -> vector<1x16xf32>
    %241 = vector.broadcast %240 : vector<1x16xf32> to vector<16x16xf32>
    %242 = arith.mulf %237, %241 : vector<16x16xf32>
    %243 = arith.truncf %242 : vector<16x16xf32> to vector<16x16xbf16>
    %244 = arith.truncf %224 : vector<16x16xf32> to vector<16x16xbf16>
    %cst_112 = arith.constant dense<0.000000e+00> : vector<16x16xf32>
    %245 = tpu.matmul %243, %244, %cst_112 {dimension_numbers = #tpu.dot_dimension_numbers<[1], [0], [0], [1], [0, 0, 1, 1], [], []>} : vector<16x16xbf16>, vector<16x16xbf16>, vector<16x16xf32> -> vector<16x16xf32>
    %c0_113 = arith.constant 0 : index
    %c0_114 = arith.constant 0 : index
    %246 = vector.load %arg30[%c0_113, %c0_114] : memref<16x16xf32, #tpu.memory_space<vmem>>, vector<16x16xf32>
    %cst_115 = arith.constant 0.000000e+00 : f32
    %247 = vector.broadcast %cst_115 : f32 to vector<8x16xf32>
    %248 = vector.extract_strided_slice %245 {offsets = [0, 0], sizes = [8, 16], strides = [1, 1]} : vector<16x16xf32> to vector<8x16xf32>
    %249 = tpu.concatenate %247, %248 in 0 : vector<8x16xf32>, vector<8x16xf32> -> vector<16x16xf32>
    %250 = arith.truncf %249 : vector<16x16xf32> to vector<16x16xbf16>
    %251 = arith.truncf %246 : vector<16x16xf32> to vector<16x16xbf16>
    %cst_116 = arith.constant dense<0.000000e+00> : vector<16x16xf32>
    %252 = tpu.matmul %250, %251, %cst_116 {dimension_numbers = #tpu.dot_dimension_numbers<[1], [0], [0], [1], [0, 0, 1, 1], [], []>} : vector<16x16xbf16>, vector<16x16xbf16>, vector<16x16xf32> -> vector<16x16xf32>
    %c0_117 = arith.constant 0 : index
    %c0_118 = arith.constant 0 : index
    %253 = vector.load %arg31[%c0_117, %c0_118] : memref<16x16xf32, #tpu.memory_space<vmem>>, vector<16x16xf32>
    %254 = arith.truncf %245 : vector<16x16xf32> to vector<16x16xbf16>
    %255 = arith.truncf %253 : vector<16x16xf32> to vector<16x16xbf16>
    %cst_119 = arith.constant dense<0.000000e+00> : vector<16x16xf32>
    %256 = tpu.matmul %254, %255, %cst_119 {dimension_numbers = #tpu.dot_dimension_numbers<[1], [0], [0], [1], [0, 0, 1, 1], [], []>} : vector<16x16xbf16>, vector<16x16xbf16>, vector<16x16xf32> -> vector<16x16xf32>
    %257 = arith.addf %252, %256 : vector<16x16xf32>
    %c0_120 = arith.constant 0 : index
    %c0_121 = arith.constant 0 : index
    %258 = vector.load %arg32[%c0_120, %c0_121] : memref<1x16xf32, #tpu.memory_space<vmem>>, vector<1x16xf32>
    %259 = vector.broadcast %258 : vector<1x16xf32> to vector<16x16xf32>
    %260 = arith.addf %257, %259 : vector<16x16xf32>
    %cst_122 = arith.constant 0.000000e+00 : f32
    %261 = vector.broadcast %cst_122 : f32 to vector<16x16xf32>
    %262 = arith.maximumf %260, %261 : vector<16x16xf32>
    %c0_123 = arith.constant 0 : index
    %c0_124 = arith.constant 0 : index
    %263 = vector.load %arg33[%c0_123, %c0_124] : memref<16x16xf32, #tpu.memory_space<vmem>>, vector<16x16xf32>
    %cst_125 = arith.constant 0.000000e+00 : f32
    %264 = vector.broadcast %cst_125 : f32 to vector<8x16xf32>
    %265 = vector.extract_strided_slice %262 {offsets = [0, 0], sizes = [8, 16], strides = [1, 1]} : vector<16x16xf32> to vector<8x16xf32>
    %266 = tpu.concatenate %264, %265 in 0 : vector<8x16xf32>, vector<8x16xf32> -> vector<16x16xf32>
    %267 = arith.truncf %266 : vector<16x16xf32> to vector<16x16xbf16>
    %268 = arith.truncf %263 : vector<16x16xf32> to vector<16x16xbf16>
    %cst_126 = arith.constant dense<0.000000e+00> : vector<16x16xf32>
    %269 = tpu.matmul %267, %268, %cst_126 {dimension_numbers = #tpu.dot_dimension_numbers<[1], [0], [0], [1], [0, 0, 1, 1], [], []>} : vector<16x16xbf16>, vector<16x16xbf16>, vector<16x16xf32> -> vector<16x16xf32>
    %c0_127 = arith.constant 0 : index
    %c0_128 = arith.constant 0 : index
    %270 = vector.load %arg34[%c0_127, %c0_128] : memref<16x16xf32, #tpu.memory_space<vmem>>, vector<16x16xf32>
    %271 = arith.truncf %262 : vector<16x16xf32> to vector<16x16xbf16>
    %272 = arith.truncf %270 : vector<16x16xf32> to vector<16x16xbf16>
    %cst_129 = arith.constant dense<0.000000e+00> : vector<16x16xf32>
    %273 = tpu.matmul %271, %272, %cst_129 {dimension_numbers = #tpu.dot_dimension_numbers<[1], [0], [0], [1], [0, 0, 1, 1], [], []>} : vector<16x16xbf16>, vector<16x16xbf16>, vector<16x16xf32> -> vector<16x16xf32>
    %274 = arith.addf %269, %273 : vector<16x16xf32>
    %c0_130 = arith.constant 0 : index
    %c0_131 = arith.constant 0 : index
    %275 = vector.load %arg35[%c0_130, %c0_131] : memref<1x16xf32, #tpu.memory_space<vmem>>, vector<1x16xf32>
    %276 = vector.broadcast %275 : vector<1x16xf32> to vector<16x16xf32>
    %277 = arith.addf %274, %276 : vector<16x16xf32>
    %cst_132 = arith.constant 0.000000e+00 : f32
    %278 = vector.broadcast %cst_132 : f32 to vector<16x16xf32>
    %279 = arith.maximumf %277, %278 : vector<16x16xf32>
    %280 = arith.addf %279, %214 : vector<16x16xf32>
    %cst_133 = arith.constant 0.000000e+00 : f32
    %281 = vector.broadcast %cst_133 : f32 to vector<16x16xf32>
    %282 = arith.maximumf %280, %281 : vector<16x16xf32>
    %c0_134 = arith.constant 0 : index
    %c0_135 = arith.constant 0 : index
    %283 = vector.load %arg36[%c0_134, %c0_135] : memref<16x10xf32, #tpu.memory_space<vmem>>, vector<16x10xf32>
    %c0_136 = arith.constant 0 : index
    %c0_137 = arith.constant 0 : index
    %284 = vector.load %arg37[%c0_136, %c0_137] : memref<1x10xf32, #tpu.memory_space<vmem>>, vector<1x10xf32>
    %285 = arith.truncf %282 : vector<16x16xf32> to vector<16x16xbf16>
    %286 = arith.truncf %283 : vector<16x10xf32> to vector<16x10xbf16>
    %cst_138 = arith.constant dense<0.000000e+00> : vector<16x10xf32>
    %287 = tpu.matmul %285, %286, %cst_138 {dimension_numbers = #tpu.dot_dimension_numbers<[1], [0], [0], [1], [0, 0, 1, 1], [], []>} : vector<16x16xbf16>, vector<16x10xbf16>, vector<16x10xf32> -> vector<16x10xf32>
    %288 = vector.broadcast %284 : vector<1x10xf32> to vector<16x10xf32>
    %289 = arith.addf %287, %288 : vector<16x10xf32>
    %c0_139 = arith.constant 0 : index
    %c0_140 = arith.constant 0 : index
    %c0_141 = arith.constant 0 : index
    %290 = vector.load %arg38[%c0_139, %c0_140, %c0_141] : memref<1x16x10xf32, #tpu.memory_space<vmem>>, vector<1x16x10xf32>
    %291 = vector.shape_cast %290 : vector<1x16x10xf32> to vector<16x10xf32>
    %292 = vector.shape_cast %289 : vector<16x10xf32> to vector<1x16x10xf32>
    tpu.vector_store %arg38[%c0_139, %c0_140, %c0_141], %292 {strides = array<i32>} : memref<1x16x10xf32, #tpu.memory_space<vmem>>, vector<1x16x10xf32>,
    return
  }
  func.func @transform_0(%arg0: i32) -> (i32, i32, i32) {
    %c0_i32 = arith.constant 0 : i32
    %c0_i32_0 = arith.constant 0 : i32
    %c0_i32_1 = arith.constant 0 : i32
    return %arg0, %c0_i32, %c0_i32_0 : i32, i32, i32
  }
  func.func @transform_1(%arg0: i32) -> (i32, i32) {
    %c0_i32 = arith.constant 0 : i32
    %c0_i32_0 = arith.constant 0 : i32
    %c0_i32_1 = arith.constant 0 : i32
    return %c0_i32, %c0_i32_0 : i32, i32
  }
  func.func @transform_2(%arg0: i32) -> (i32, i32) {
    %c0_i32 = arith.constant 0 : i32
    %c0_i32_0 = arith.constant 0 : i32
    %c0_i32_1 = arith.constant 0 : i32
    return %c0_i32, %c0_i32_0 : i32, i32
  }
  func.func @transform_3(%arg0: i32) -> (i32, i32) {
    %c0_i32 = arith.constant 0 : i32
    %c0_i32_0 = arith.constant 0 : i32
    %c0_i32_1 = arith.constant 0 : i32
    return %c0_i32, %c0_i32_0 : i32, i32
  }
  func.func @transform_4(%arg0: i32) -> (i32, i32) {
    %c0_i32 = arith.constant 0 : i32
    %c0_i32_0 = arith.constant 0 : i32
    %c0_i32_1 = arith.constant 0 : i32
    return %c0_i32, %c0_i32_0 : i32, i32
  }
  func.func @transform_5(%arg0: i32) -> (i32, i32) {
    %c0_i32 = arith.constant 0 : i32
    %c0_i32_0 = arith.constant 0 : i32
    %c0_i32_1 = arith.constant 0 : i32
    return %c0_i32, %c0_i32_0 : i32, i32
  }
  func.func @transform_6(%arg0: i32) -> (i32, i32) {
    %c0_i32 = arith.constant 0 : i32
    %c0_i32_0 = arith.constant 0 : i32
    %c0_i32_1 = arith.constant 0 : i32
    return %c0_i32, %c0_i32_0 : i32, i32
  }
  func.func @transform_7(%arg0: i32) -> (i32, i32) {
    %c0_i32 = arith.constant 0 : i32
    %c0_i32_0 = arith.constant 0 : i32
    %c0_i32_1 = arith.constant 0 : i32
    return %c0_i32, %c0_i32_0 : i32, i32
  }
  func.func @transform_8(%arg0: i32) -> (i32, i32) {
    %c0_i32 = arith.constant 0 : i32
    %c0_i32_0 = arith.constant 0 : i32
    %c0_i32_1 = arith.constant 0 : i32
    return %c0_i32, %c0_i32_0 : i32, i32
  }
  func.func @transform_9(%arg0: i32) -> (i32, i32) {
    %c0_i32 = arith.constant 0 : i32
    %c0_i32_0 = arith.constant 0 : i32
    %c0_i32_1 = arith.constant 0 : i32
    return %c0_i32, %c0_i32_0 : i32, i32
  }
  func.func @transform_10(%arg0: i32) -> (i32, i32) {
    %c0_i32 = arith.constant 0 : i32
    %c0_i32_0 = arith.constant 0 : i32
    %c0_i32_1 = arith.constant 0 : i32
    return %c0_i32, %c0_i32_0 : i32, i32
  }
  func.func @transform_11(%arg0: i32) -> (i32, i32) {
    %c0_i32 = arith.constant 0 : i32
    %c0_i32_0 = arith.constant 0 : i32
    %c0_i32_1 = arith.constant 0 : i32
    return %c0_i32, %c0_i32_0 : i32, i32
  }
  func.func @transform_12(%arg0: i32) -> (i32, i32) {
    %c0_i32 = arith.constant 0 : i32
    %c0_i32_0 = arith.constant 0 : i32
    %c0_i32_1 = arith.constant 0 : i32
    return %c0_i32, %c0_i32_0 : i32, i32
  }
  func.func @transform_13(%arg0: i32) -> (i32, i32) {
    %c0_i32 = arith.constant 0 : i32
    %c0_i32_0 = arith.constant 0 : i32
    %c0_i32_1 = arith.constant 0 : i32
    return %c0_i32, %c0_i32_0 : i32, i32
  }
  func.func @transform_14(%arg0: i32) -> (i32, i32) {
    %c0_i32 = arith.constant 0 : i32
    %c0_i32_0 = arith.constant 0 : i32
    %c0_i32_1 = arith.constant 0 : i32
    return %c0_i32, %c0_i32_0 : i32, i32
  }
  func.func @transform_15(%arg0: i32) -> (i32, i32) {
    %c0_i32 = arith.constant 0 : i32
    %c0_i32_0 = arith.constant 0 : i32
    %c0_i32_1 = arith.constant 0 : i32
    return %c0_i32, %c0_i32_0 : i32, i32
  }
  func.func @transform_16(%arg0: i32) -> (i32, i32) {
    %c0_i32 = arith.constant 0 : i32
    %c0_i32_0 = arith.constant 0 : i32
    %c0_i32_1 = arith.constant 0 : i32
    return %c0_i32, %c0_i32_0 : i32, i32
  }
  func.func @transform_17(%arg0: i32) -> (i32, i32) {
    %c0_i32 = arith.constant 0 : i32
    %c0_i32_0 = arith.constant 0 : i32
    %c0_i32_1 = arith.constant 0 : i32
    return %c0_i32, %c0_i32_0 : i32, i32
  }
  func.func @transform_18(%arg0: i32) -> (i32, i32) {
    %c0_i32 = arith.constant 0 : i32
    %c0_i32_0 = arith.constant 0 : i32
    %c0_i32_1 = arith.constant 0 : i32
    return %c0_i32, %c0_i32_0 : i32, i32
  }
  func.func @transform_19(%arg0: i32) -> (i32, i32) {
    %c0_i32 = arith.constant 0 : i32
    %c0_i32_0 = arith.constant 0 : i32
    %c0_i32_1 = arith.constant 0 : i32
    return %c0_i32, %c0_i32_0 : i32, i32
  }
  func.func @transform_20(%arg0: i32) -> (i32, i32) {
    %c0_i32 = arith.constant 0 : i32
    %c0_i32_0 = arith.constant 0 : i32
    %c0_i32_1 = arith.constant 0 : i32
    return %c0_i32, %c0_i32_0 : i32, i32
  }
  func.func @transform_21(%arg0: i32) -> (i32, i32) {
    %c0_i32 = arith.constant 0 : i32
    %c0_i32_0 = arith.constant 0 : i32
    %c0_i32_1 = arith.constant 0 : i32
    return %c0_i32, %c0_i32_0 : i32, i32
  }
  func.func @transform_22(%arg0: i32) -> (i32, i32) {
    %c0_i32 = arith.constant 0 : i32
    %c0_i32_0 = arith.constant 0 : i32
    %c0_i32_1 = arith.constant 0 : i32
    return %c0_i32, %c0_i32_0 : i32, i32
  }
  func.func @transform_23(%arg0: i32) -> (i32, i32) {
    %c0_i32 = arith.constant 0 : i32
    %c0_i32_0 = arith.constant 0 : i32
    %c0_i32_1 = arith.constant 0 : i32
    return %c0_i32, %c0_i32_0 : i32, i32
  }
  func.func @transform_24(%arg0: i32) -> (i32, i32) {
    %c0_i32 = arith.constant 0 : i32
    %c0_i32_0 = arith.constant 0 : i32
    %c0_i32_1 = arith.constant 0 : i32
    return %c0_i32, %c0_i32_0 : i32, i32
  }
  func.func @transform_25(%arg0: i32) -> (i32, i32) {
    %c0_i32 = arith.constant 0 : i32
    %c0_i32_0 = arith.constant 0 : i32
    %c0_i32_1 = arith.constant 0 : i32
    return %c0_i32, %c0_i32_0 : i32, i32
  }
  func.func @transform_26(%arg0: i32) -> (i32, i32) {
    %c0_i32 = arith.constant 0 : i32
    %c0_i32_0 = arith.constant 0 : i32
    %c0_i32_1 = arith.constant 0 : i32
    return %c0_i32, %c0_i32_0 : i32, i32
  }
  func.func @transform_27(%arg0: i32) -> (i32, i32) {
    %c0_i32 = arith.constant 0 : i32
    %c0_i32_0 = arith.constant 0 : i32
    %c0_i32_1 = arith.constant 0 : i32
    return %c0_i32, %c0_i32_0 : i32, i32
  }
  func.func @transform_28(%arg0: i32) -> (i32, i32) {
    %c0_i32 = arith.constant 0 : i32
    %c0_i32_0 = arith.constant 0 : i32
    %c0_i32_1 = arith.constant 0 : i32
    return %c0_i32, %c0_i32_0 : i32, i32
  }
  func.func @transform_29(%arg0: i32) -> (i32, i32) {
    %c0_i32 = arith.constant 0 : i32
    %c0_i32_0 = arith.constant 0 : i32
    %c0_i32_1 = arith.constant 0 : i32
    return %c0_i32, %c0_i32_0 : i32, i32
  }
  func.func @transform_30(%arg0: i32) -> (i32, i32) {
    %c0_i32 = arith.constant 0 : i32
    %c0_i32_0 = arith.constant 0 : i32
    %c0_i32_1 = arith.constant 0 : i32
    return %c0_i32, %c0_i32_0 : i32, i32
  }
  func.func @transform_31(%arg0: i32) -> (i32, i32) {
    %c0_i32 = arith.constant 0 : i32
    %c0_i32_0 = arith.constant 0 : i32
    %c0_i32_1 = arith.constant 0 : i32
    return %c0_i32, %c0_i32_0 : i32, i32
  }
  func.func @transform_32(%arg0: i32) -> (i32, i32) {
    %c0_i32 = arith.constant 0 : i32
    %c0_i32_0 = arith.constant 0 : i32
    %c0_i32_1 = arith.constant 0 : i32
    return %c0_i32, %c0_i32_0 : i32, i32
  }
  func.func @transform_33(%arg0: i32) -> (i32, i32) {
    %c0_i32 = arith.constant 0 : i32
    %c0_i32_0 = arith.constant 0 : i32
    %c0_i32_1 = arith.constant 0 : i32
    return %c0_i32, %c0_i32_0 : i32, i32
  }
  func.func @transform_34(%arg0: i32) -> (i32, i32) {
    %c0_i32 = arith.constant 0 : i32
    %c0_i32_0 = arith.constant 0 : i32
    %c0_i32_1 = arith.constant 0 : i32
    return %c0_i32, %c0_i32_0 : i32, i32
  }
  func.func @transform_35(%arg0: i32) -> (i32, i32) {
    %c0_i32 = arith.constant 0 : i32
    %c0_i32_0 = arith.constant 0 : i32
    %c0_i32_1 = arith.constant 0 : i32
    return %c0_i32, %c0_i32_0 : i32, i32
  }
  func.func @transform_36(%arg0: i32) -> (i32, i32) {
    %c0_i32 = arith.constant 0 : i32
    %c0_i32_0 = arith.constant 0 : i32
    %c0_i32_1 = arith.constant 0 : i32
    return %c0_i32, %c0_i32_0 : i32, i32
  }
  func.func @transform_37(%arg0: i32) -> (i32, i32, i32) {
    %c0_i32 = arith.constant 0 : i32
    %c0_i32_0 = arith.constant 0 : i32
    %c0_i32_1 = arith.constant 0 : i32
    return %arg0, %c0_i32, %c0_i32_0 : i32, i32, i32
  }
}

</mosaic_0001>

<bundles_post_ra>
// kernel: tcanet_forward.1
= control target key start
LH: loop header
LB: loop body
LE: loop exit
PB: predicated region body
PF: predicated region fallthrough
CT: control target
= control target key end

     0   :  { %s4314_s6 = smov 1   ;;  %s4315_s10 = smov 2   ;;  %s5187_s0 = inlined_call_operand.smem [shape: u32[38], index: -1, kind: input, shape index: {}] }
   0x1   :  { %s4393_s5 = sld [smem:[%s5187_s0]]   ;;  %s4316_s14 = smov 3  }
   0x2   :  { %s4398_s9 = sld [smem:[%s5187_s0 + %s4314_s6]]   ;;  %s4317_s18 = smov 4  }
   0x3   :  { %s4403_s13 = sld [smem:[%s5187_s0 + %s4315_s10]]   ;;  %s4318_s22 = smov 5  }
   0x4   :  { %s4408_s17 = sld [smem:[%s5187_s0 + %s4316_s14]]   ;;  %s4319_s26 = smov 6  }
   0x5   :  { %s4413_s21 = sld [smem:[%s5187_s0 + %s4317_s18]]   ;;  %s4320_s30 = smov 7  }
   0x6   :  { %s4418_s25 = sld [smem:[%s5187_s0 + %s4318_s22]]   ;;  %s4321_s4 = smov 8  }
   0x7   :  { %5227 = sst [smem:[#allocation61_spill]] %s4393_s5  ;;  %s4322_s10 = smov 9  }
   0x8   :  { %5228 = sst [smem:[#allocation62_spill]] %s4398_s9  ;;  %s4323_s15 = smov 10  }
   0x9   :  { %5229 = sst [smem:[#allocation63_spill]] %s4403_s13  ;;  %s4324_s20 = smov 11  }
   0xa   :  { %5230 = sst [smem:[#allocation64_spill]] %s4408_s17  ;;  %s4326_s1 = smov 13  }
   0xb   :  { %s4423_s29 = sld [smem:[%s5187_s0 + %s4319_s26]]   ;;  %s4325_s26 = smov 12  }
   0xc   :  { %5231 = sst [smem:[#allocation65_spill]] %s4418_s25  ;;  %s4327_s7 = smov 14  }
   0xd   :  { %s4428_s3 = sld [smem:[%s5187_s0 + %s4320_s30]]   ;;  %s4329_s22 = smov 16  }
   0xe   :  { %s4433_s8 = sld [smem:[%s5187_s0 + %s4321_s4]]   ;;  %s4330_s28 = smov 17  }
   0xf   :  { %s4438_s14 = sld [smem:[%s5187_s0 + %s4322_s10]]  }
  0x10   :  { %s4443_s19 = sld [smem:[%s5187_s0 + %s4323_s15]]   ;;  %s4328_s15 = smov 15  }
  0x11   :  { %5232 = sst [smem:[#allocation66_spill]] %s4423_s29 }
  0x12   :  { %s4448_s24 = sld [smem:[%s5187_s0 + %s4324_s20]]  }
  0x13   :  { %5233 = sst [smem:[#allocation67_spill]] %s4428_s3 }
  0x14   :  { %5234 = sst [smem:[#allocation68_spill]] %s4433_s8 }
  0x15   :  { %5235 = sst [smem:[#allocation69_spill]] %s4438_s14 }
  0x16   :  { %s4453_s30 = sld [smem:[%s5187_s0 + %s4325_s26]]  }
  0x17   :  { %s4458_s6 = sld [smem:[%s5187_s0 + %s4326_s1]]  }
  0x18   :  { %5236 = sst [smem:[#allocation70_spill]] %s4448_s24 }
  0x19   :  { %s4463_s12 = sld [smem:[%s5187_s0 + %s4327_s7]]   ;;  %s4331_s7 = smov 18  }
  0x1a   :  { %s4468_s20 = sld [smem:[%s5187_s0 + %s4328_s15]]   ;;  %s4332_s15 = smov 19  }
  0x1b   :  { %s4473_s27 = sld [smem:[%s5187_s0 + %s4329_s22]]   ;;  %s4333_s22 = smov 20  }
  0x1c   :  { %5237 = sst [smem:[#allocation71_spill]] %s4453_s30 }
  0x1d   :  { %5238 = sst [smem:[#allocation72_spill]] %s4458_s6 }
  0x1e   :  { %s4478_s4 = sld [smem:[%s5187_s0 + %s4330_s28]]   ;;  %s4334_s28 = smov 21  }
  0x1f   :  { %5239 = sst [smem:[#allocation73_spill]] %s4463_s12 }
  0x20   :  { %s4483_s24 = sld [smem:[%s5187_s0 + %s4331_s7]]   ;;  %s4335_s7 = smov 22  }
  0x21   :  { %5240 = sst [smem:[#allocation74_spill]] %s4473_s27 }
  0x22   :  { %s4488_s29 = sld [smem:[%s5187_s0 + %s4332_s15]]   ;;  %s4336_s15 = smov 23  }
  0x23   :  { %s4493_s27 = sld [smem:[%s5187_s0 + %s4333_s22]]   ;;  %s4337_s22 = smov 24  }
  0x24   :  { %5241 = sst [smem:[#allocation75_spill]] %s4478_s4 }
  0x25   :  { %s4498_s3 = sld [smem:[%s5187_s0 + %s4334_s28]]   ;;  %s4338_s28 = smov 25  }
  0x26   :  { %s4503_s5 = sld [smem:[%s5187_s0 + %s4335_s7]]   ;;  %s4339_s7 = smov 26  }
  0x27   :  { %s4513_s4 = sld [smem:[%s5187_s0 + %s4337_s22]]   ;;  %s4341_s22 = smov 28  }
  0x28   :  { %5242 = sst [smem:[#allocation76_spill]] %s4488_s29 }
  0x29   :  { %s4508_s29 = sld [smem:[%s5187_s0 + %s4336_s15]]   ;;  %s4340_s15 = smov 27  }
  0x2a   :  { %s4523_s12 = sld [smem:[%s5187_s0 + %s4339_s7]]   ;;  %s4343_s7 = smov 30  }
  0x2b   :  { %5243 = sst [smem:[#allocation77_spill]] %s4498_s3 }
  0x2c   :  { %5244 = sst [smem:[#allocation78_spill]] %s4503_s5 }
  0x2d   :  { %5246 = sst [smem:[#allocation80_spill]] %s4513_s4 }
  0x2e   :  { %s4518_s3 = sld [smem:[%s5187_s0 + %s4338_s28]]   ;;  %s4342_s28 = smov 29  }
  0x2f   :  { %5245 = sst [smem:[#allocation79_spill]] %s4508_s29 }
  0x30   :  { %5248 = sst [smem:[#allocation82_spill]] %s4523_s12 }
  0x31   :  { %s4528_s29 = sld [smem:[%s5187_s0 + %s4340_s15]]   ;;  %s4344_s15 = smov 31  }
  0x32   :  { %s4533_s30 = sld [smem:[%s5187_s0 + %s4341_s22]]   ;;  %s4345_s22 = smov 32  }
  0x33   :  { %s4543_s14 = sld [smem:[%s5187_s0 + %s4343_s7]]   ;;  %s4347_s7 = smov 34  }
  0x34   :  { %5247 = sst [smem:[#allocation81_spill]] %s4518_s3 }
  0x35   :  { %s4538_s3 = sld [smem:[%s5187_s0 + %s4342_s28]]   ;;  %s4346_s28 = smov 33  }
  0x36   :  { %s4553_s25 = sld [smem:[%s5187_s0 + %s4345_s22]]   ;;  %s4349_s22 = smov 36  }
  0x37   :  { %5249 = sst [smem:[#allocation83_spill]] %s4528_s29 }
  0x38   :  { %s4548_s29 = sld [smem:[%s5187_s0 + %s4344_s15]]   ;;  %s4348_s15 = smov 35  }
  0x39   :  { %5251 = sst [smem:[#allocation85_spill]] %s4543_s14 }
  0x3a   :  { %s4563_s17 = sld [smem:[%s5187_s0 + %s4347_s7]]  }
  0x3b   :  { %5250 = sst [smem:[#allocation84_spill]] %s4538_s3 }
  0x3c   :  { %s4558_s3 = sld [smem:[%s5187_s0 + %s4346_s28]]   ;;  %s4350_s28 = smov 37  }
  0x3d   :  { %s4573_s9 = sld [smem:[%s5187_s0 + %s4349_s22]]  }
  0x3e   :  { %5252 = sst [smem:[#allocation86_spill]] %s4548_s29 }
  0x3f   :  { %s4568_s29 = sld [smem:[%s5187_s0 + %s4348_s15]]  }
  0x42   :  { %5253 = sst [smem:[#allocation87_spill]] %s4558_s3 }
  0x43   :  { %s4578_s3 = sld [smem:[%s5187_s0 + %s4350_s28]]  }
  0x44   :  { %80 = vsyncpa [#allocation3], 0 }
  0x45   :  { %81 = vsyncpa [#allocation5], 0 }
  0x46   :  { %82 = vsyncpa [#allocation8], 0 }
  0x47   :  { %83 = vsyncpa [#allocation11], 0 }
  0x48   :  { %84 = vsyncpa [#allocation14], 0 }
  0x49   :  { %85 = vsyncpa [#allocation17], 0 }
  0x4a   :  { %86 = vsyncpa [#allocation20], 0 }
  0x4b   :  { %87 = vsyncpa [#allocation23], 0 }
  0x4c   :  { %88 = vsyncpa [#allocation26], 0 }
  0x4d   :  { %89 = vsyncpa [#allocation29], 0 }
  0x4e   :  { %90 = vsyncpa [#allocation32], 0 }
  0x4f   :  { %91 = vsyncpa [#allocation35], 0 }
  0x50   :  { %92 = vsyncpa [#allocation38], 0 }
  0x51   :  { %93 = vsyncpa [#allocation41], 0 }
  0x52   :  { %94 = vsyncpa [#allocation44], 0  ;;  %s4580_s7 = smov 0  }
  0x53 LB: > { %s5254_s14 = sld [smem:[#allocation85_spill]]  ;;  %s4586_s0 = sadd.s32 4294967295, %s4312_s7   ;;  %s4312_s7 = sphi %s4580_s7, %s100_s7  }
  0x54   : > { %s5255_s13 = sld [smem:[#allocation63_spill]]  ;;  %p3044_p0 = scmp.ge.s32.totalorder %s4312_s7, 1 }
  0x55   : > { %s5256_s12 = sld [smem:[#allocation82_spill]]  ;;  %p913_p1 = scmp.lt.s32.totalorder %s4312_s7, 3 }
  0x56   : > { %s5257_s8 = sld [smem:[#allocation68_spill]] }
  0x57   : > { %s5258_s5 = sld [smem:[#allocation78_spill]]  ;;  %p4590_p2 = pnand %p3044_p0, %p913_p1 }
  0x58   : > { %s5259_s4 = sld [smem:[#allocation80_spill]]  ;;  %p3259_p3 = scmp.eq.s32.totalorder (!%p4590_p2), %s4586_s0, 0 }
  0x59   : > { %s5260_s6 = sld [smem:[#allocation72_spill]]  ;;  %917 = sbr.rel (%p4590_p2) target bundleno = 468 (0x1d4), region = 12 }
  0x5a   : > { %s937_s11 = sshll.u32 (!%p4590_p2), %s5255_s13, 4  ;;  %s4351_s15 = smov (!%p4590_p2), [#allocation4]   ;;  %s938_s11 = int_to_ptr.hbm [resolvable:$true] %s937_s11 }
  0x5b   : > { %s939_s16 = sshll.u32 (!%p4590_p2), %s4351_s15, 4  ;;  %s961_s18 = sshll.u32 (!%p4590_p2), %s4413_s21, 4  ;;  %s940_s16 = int_to_ptr.vmem [resolvable:$true] %s939_s16  ;;  %s4599_s18 = int_to_ptr.hbm [resolvable:$true] %s961_s18 }
  0x5c   : > { %s3434_s22 = sshra.s32 (!%p4590_p2), %s938_s11, 4  ;;  %s3440_s26 = scalar_lea.hbm (!%p4590_p2), %s5255_s13, 1  ;;  %s3435_s22 = int_to_ptr.hbm [resolvable:$true] %s3434_s22 }
  0x5d   : > { %s3436_s23 = scalar_lea.hbm (!%p4590_p2), %s3435_s22, 1  ;;  %p3441_p7 = scmp.lt.s32.totalorder (!%p4590_p2), %s3435_s22, %s5255_s13 }
  0x5e   : > { %p3437_p4 = scmp.ne.s32.totalorder %s3435_s22, %s3436_s23  ;;  %p3442_p8 = scmp.lt.s32.totalorder %s3440_s26, %s3436_s23 }
  0x60   : > { %p3438_p5 = pnand %p3437_p4, %p3259_p3  ;;  %p3443_p9 = por %p3442_p8, %p3441_p7 }
  0x62   : > { %p3439_p6 = pneg %p3438_p5 }
  0x64   : > { %p3444_p10 = pnand %p3443_p9, %p3439_p6 }
  0x66   : > { %3447 = shalt.err (!%p3444_p10)
}
  0x67   : > { %3146 = dma.hbm_to_vmem [thread:$0]  (%p3259_p3), %s938_s11, 16, %s940_s16, [#allocation5]  }
  0x68   : > { %s991_s28 = sshll.u32 %s5257_s8, 4  ;;  %s4352_s1 = smov [#allocation7]   ;;  %s4608_s28 = int_to_ptr.hbm [resolvable:$true] %s991_s28 }
  0x69   : > { %s963_s2 = sshll.u32 %s4352_s1, 4  ;;  %s3462_s15 = sshra.s32 %s4599_s18, 4  ;;  %s964_s2 = int_to_ptr.vmem [resolvable:$true] %s963_s2  ;;  %s3463_s15 = int_to_ptr.hbm [resolvable:$true] %s3462_s15 }
  0x6a   : > { %s3464_s22 = scalar_lea.hbm %s3463_s15, 8  ;;  %s3468_s23 = scalar_lea.hbm %s4413_s21, 8 }
  0x6b   : > { %p3465_p11 = scmp.ne.s32.totalorder %s3463_s15, %s3464_s22  ;;  %p3469_p0 = scmp.lt.s32.totalorder %s3463_s15, %s4413_s21 }
  0x6c   : > { %p3470_p1 = scmp.lt.s32.totalorder %s3468_s23, %s3464_s22 }
  0x6d   : > { %p3466_p12 = pnand %p3465_p11, %p3259_p3 }
  0x6e   : > { %p3471_p4 = por %p3470_p1, %p3469_p0 }
  0x6f   : > { %p3467_p13 = pneg %p3466_p12 }
  0x71   : > { %p3472_p5 = pnand %p3471_p4, %p3467_p13 }
  0x73   : > { %3475 = shalt.err (!%p3472_p5)
}
  0x74   : > { %3150 = dma.hbm_to_vmem [thread:$0]  (%p3259_p3), %s4599_s18, 128, %s964_s2, [#allocation8]  }
  0x75   : > { %s4353_s11 = smov [#allocation10]   ;;  %s1015_s26 = sshll.u32 %s4443_s19, 4  ;;  %s4619_s26 = int_to_ptr.hbm [resolvable:$true] %s1015_s26 }
  0x76   : > { %s993_s16 = sshll.u32 %s4353_s11, 4  ;;  %s3490_s1 = sshra.s32 %s4608_s28, 4  ;;  %s994_s16 = int_to_ptr.vmem [resolvable:$true] %s993_s16  ;;  %s3491_s1 = int_to_ptr.hbm [resolvable:$true] %s3490_s1 }
  0x77   : > { %s3492_s15 = scalar_lea.hbm %s3491_s1, 1  ;;  %s3496_s22 = scalar_lea.hbm %s5257_s8, 1 }
  0x78   : > { %p3493_p6 = scmp.ne.s32.totalorder %s3491_s1, %s3492_s15  ;;  %p3497_p9 = scmp.lt.s32.totalorder %s3491_s1, %s5257_s8 }
  0x79   : > { %p3498_p10 = scmp.lt.s32.totalorder %s3496_s22, %s3492_s15 }
  0x7a   : > { %p3494_p7 = pnand %p3493_p6, %p3259_p3 }
  0x7b   : > { %p3499_p11 = por %p3498_p10, %p3497_p9 }
  0x7c   : > { %p3495_p8 = pneg %p3494_p7 }
  0x7e   : > { %p3500_p12 = pnand %p3499_p11, %p3495_p8 }
  0x80   : > { %3503 = shalt.err (!%p3500_p12)
}
  0x81   : > { %3154 = dma.hbm_to_vmem [thread:$0]  (%p3259_p3), %s4608_s28, 16, %s994_s16, [#allocation11]  }
  0x82   : > { %s1041_s18 = sshll.u32 %s5260_s6, 4  ;;  %s4354_s2 = smov [#allocation13]   ;;  %s4630_s18 = int_to_ptr.hbm [resolvable:$true] %s1041_s18 }
  0x83   : > { %s1017_s23 = sshll.u32 %s4354_s2, 4  ;;  %s3518_s11 = sshra.s32 %s4619_s26, 4  ;;  %s1018_s23 = int_to_ptr.vmem [resolvable:$true] %s1017_s23  ;;  %s3519_s11 = int_to_ptr.hbm [resolvable:$true] %s3518_s11 }
  0x84   : > { %s3520_s1 = scalar_lea.hbm %s3519_s11, 1  ;;  %s3524_s15 = scalar_lea.hbm %s4443_s19, 1 }
  0x85   : > { %p3521_p13 = scmp.ne.s32.totalorder %s3519_s11, %s3520_s1  ;;  %p3525_p4 = scmp.lt.s32.totalorder %s3519_s11, %s4443_s19 }
  0x86   : > { %p3526_p5 = scmp.lt.s32.totalorder %s3524_s15, %s3520_s1 }
  0x87   : > { %p3522_p0 = pnand %p3521_p13, %p3259_p3 }
  0x88   : > { %p3527_p6 = por %p3526_p5, %p3525_p4 }
  0x89   : > { %p3523_p1 = pneg %p3522_p0 }
  0x8b   : > { %p3528_p7 = pnand %p3527_p6, %p3523_p1 }
  0x8d   : > { %3531 = shalt.err (!%p3528_p7)
}
  0x8e   : > { %3158 = dma.hbm_to_vmem [thread:$0]  (%p3259_p3), %s4619_s26, 16, %s1018_s23, [#allocation14]  }
  0x8f   : > { %s4355_s28 = smov [#allocation16]   ;;  %s3546_s22 = sshra.s32 %s4630_s18, 4  ;;  %s3547_s22 = int_to_ptr.hbm [resolvable:$true] %s3546_s22 }
  0x90   : > { %s1043_s16 = sshll.u32 %s4355_s28, 4  ;;  %s3548_s2 = scalar_lea.hbm %s3547_s22, 16  ;;  %s1044_s16 = int_to_ptr.vmem [resolvable:$true] %s1043_s16 }
  0x91   : > { %p3549_p8 = scmp.ne.s32.totalorder %s3547_s22, %s3548_s2  ;;  %s3552_s11 = scalar_lea.hbm %s5260_s6, 16 }
  0x92   : > { %p3553_p11 = scmp.lt.s32.totalorder %s3547_s22, %s5260_s6  ;;  %p3554_p12 = scmp.lt.s32.totalorder %s3552_s11, %s3548_s2 }
  0x93   : > { %p3550_p9 = pnand %p3549_p8, %p3259_p3 }
  0x94   : > { %p3555_p13 = por %p3554_p12, %p3553_p11 }
  0x95   : > { %p3551_p10 = pneg %p3550_p9 }
  0x97   : > { %p3556_p0 = pnand %p3555_p13, %p3551_p10 }
  0x99   : > { %3559 = shalt.err (!%p3556_p0)
}
  0x9a   : > { %s5208_s1 = smov 128   ;;  %s5212_s26 = smov 8  }
  0x9b   : > { %3162 = dma.hbm_to_vmem [thread:$0]  (%p3259_p3), %s4630_s18, 256, %s1044_s16, [#allocation17], %s5208_s1, %s5208_s1, %s5212_s26  }
  0x9c   : > { %s1070_s23 = sshll.u32 %s4468_s20, 4  ;;  %s4358_s15 = smov [#allocation19]   ;;  %s1071_s23 = int_to_ptr.hbm [resolvable:$true] %s1070_s23 }
  0x9d   : > { %s1072_s28 = sshll.u32 %s4358_s15, 4  ;;  %s1099_s22 = sshll.u32 %s4483_s24, 4  ;;  %s1073_s28 = int_to_ptr.vmem [resolvable:$true] %s1072_s28  ;;  %s1100_s22 = int_to_ptr.hbm [resolvable:$true] %s1099_s22 }
  0x9e   : > { %s3574_s2 = sshra.s32 %s1071_s23, 4  ;;  %s3580_s6 = scalar_lea.hbm %s4468_s20, 1  ;;  %s3575_s2 = int_to_ptr.hbm [resolvable:$true] %s3574_s2 }
  0x9f   : > { %s3576_s11 = scalar_lea.hbm %s3575_s2, 1  ;;  %p3581_p6 = scmp.lt.s32.totalorder %s3575_s2, %s4468_s20 }
  0xa0   : > { %p3577_p1 = scmp.ne.s32.totalorder %s3575_s2, %s3576_s11  ;;  %p3582_p7 = scmp.lt.s32.totalorder %s3580_s6, %s3576_s11 }
  0xa2   : > { %p3578_p4 = pnand %p3577_p1, %p3259_p3  ;;  %p3583_p8 = por %p3582_p7, %p3581_p6 }
  0xa4   : > { %p3579_p5 = pneg %p3578_p4 }
  0xa6   : > { %p3584_p9 = pnand %p3583_p8, %p3579_p5 }
  0xa8   : > { %3587 = shalt.err (!%p3584_p9)
}
  0xa9   : > { %3166 = dma.hbm_to_vmem [thread:$0]  (%p3259_p3), %s1071_s23, 16, %s1073_s28, [#allocation20]  }
  0xaa   : > { %s4359_s18 = smov [#allocation22]   ;;  %s1125_s15 = sshll.u32 %s4493_s27, 4  ;;  %s4660_s15 = int_to_ptr.hbm [resolvable:$true] %s1125_s15 }
  0xab   : > { %s1101_s16 = sshll.u32 %s4359_s18, 4  ;;  %s3602_s1 = sshra.s32 %s1100_s22, 4  ;;  %s1102_s16 = int_to_ptr.vmem [resolvable:$true] %s1101_s16  ;;  %s3603_s1 = int_to_ptr.hbm [resolvable:$true] %s3602_s1 }
  0xac   : > { %s3604_s6 = scalar_lea.hbm %s3603_s1, 1  ;;  %s3608_s2 = scalar_lea.hbm %s4483_s24, 1 }
  0xad   : > { %p3605_p10 = scmp.ne.s32.totalorder %s3603_s1, %s3604_s6  ;;  %p3609_p13 = scmp.lt.s32.totalorder %s3603_s1, %s4483_s24 }
  0xae   : > { %p3610_p0 = scmp.lt.s32.totalorder %s3608_s2, %s3604_s6 }
  0xaf   : > { %p3606_p11 = pnand %p3605_p10, %p3259_p3 }
  0xb0   : > { %p3611_p1 = por %p3610_p0, %p3609_p13 }
  0xb1   : > { %p3607_p12 = pneg %p3606_p11 }
  0xb3   : > { %p3612_p4 = pnand %p3611_p1, %p3607_p12 }
  0xb5   : > { %3615 = shalt.err (!%p3612_p4)
}
  0xb6   : > { %3170 = dma.hbm_to_vmem [thread:$0]  (%p3259_p3), %s1100_s22, 16, %s1102_s16, [#allocation23]  }
  0xb7   : > { %s1150_s23 = sshll.u32 %s5258_s5, 4  ;;  %s4360_s28 = smov [#allocation25]   ;;  %s4669_s23 = int_to_ptr.hbm [resolvable:$true] %s1150_s23 }
  0xb8   : > { %s1127_s11 = sshll.u32 %s4360_s28, 4  ;;  %s3630_s18 = sshra.s32 %s4660_s15, 4  ;;  %s1128_s11 = int_to_ptr.vmem [resolvable:$true] %s1127_s11  ;;  %s3631_s18 = int_to_ptr.hbm [resolvable:$true] %s3630_s18 }
  0xb9   : > { %s3632_s1 = scalar_lea.hbm %s3631_s18, 1  ;;  %s3636_s6 = scalar_lea.hbm %s4493_s27, 1 }
  0xba   : > { %p3633_p5 = scmp.ne.s32.totalorder %s3631_s18, %s3632_s1  ;;  %p3637_p8 = scmp.lt.s32.totalorder %s3631_s18, %s4493_s27 }
  0xbb   : > { %p3638_p9 = scmp.lt.s32.totalorder %s3636_s6, %s3632_s1 }
  0xbc   : > { %p3634_p6 = pnand %p3633_p5, %p3259_p3 }
  0xbd   : > { %p3639_p10 = por %p3638_p9, %p3637_p8 }
  0xbe   : > { %p3635_p7 = pneg %p3634_p6 }
  0xc0   : > { %p3640_p11 = pnand %p3639_p10, %p3635_p7 }
  0xc2   : > { %3643 = shalt.err (!%p3640_p11)
}
  0xc3   : > { %3174 = dma.hbm_to_vmem [thread:$0]  (%p3259_p3), %s4660_s15, 16, %s1128_s11, [#allocation26]  }
  0xc4   : > { %s4361_s22 = smov [#allocation28]   ;;  %s1176_s2 = sshll.u32 %s5259_s4, 4  ;;  %s4680_s2 = int_to_ptr.hbm [resolvable:$true] %s1176_s2 }
  0xc5   : > { %s1152_s16 = sshll.u32 %s4361_s22, 4  ;;  %s3658_s28 = sshra.s32 %s4669_s23, 4  ;;  %s1153_s16 = int_to_ptr.vmem [resolvable:$true] %s1152_s16  ;;  %s3659_s28 = int_to_ptr.hbm [resolvable:$true] %s3658_s28 }
  0xc6   : > { %s3660_s18 = scalar_lea.hbm %s3659_s28, 16  ;;  %s3664_s1 = scalar_lea.hbm %s5258_s5, 16 }
  0xc7   : > { %p3661_p12 = scmp.ne.s32.totalorder %s3659_s28, %s3660_s18  ;;  %p3665_p1 = scmp.lt.s32.totalorder %s3659_s28, %s5258_s5 }
  0xc8   : > { %p3666_p4 = scmp.lt.s32.totalorder %s3664_s1, %s3660_s18 }
  0xc9   : > { %p3662_p13 = pnand %p3661_p12, %p3259_p3 }
  0xca   : > { %p3667_p5 = por %p3666_p4, %p3665_p1 }
  0xcb   : > { %p3663_p0 = pneg %p3662_p13 }
  0xcd   : > { %p3668_p6 = pnand %p3667_p5, %p3663_p0 }
  0xcf   : > { %3671 = shalt.err (!%p3668_p6)
}
  0xd0   : > { %s5262_s15 = smov 128   ;;  %s1205_s11 = sshll.u32 %s5256_s12, 4  ;;  %s4694_s11 = int_to_ptr.hbm [resolvable:$true] %s1205_s11 }
  0xd1   : > { %3178 = dma.hbm_to_vmem [thread:$0]  (%p3259_p3), %s4669_s23, 256, %s1153_s16, [#allocation29], %s5262_s15, %s5262_s15, %s5212_s26  }
  0xd2   : > { %s4362_s6 = smov [#allocation31]   ;;  %s3686_s28 = sshra.s32 %s4680_s2, 4  ;;  %s3687_s28 = int_to_ptr.hbm [resolvable:$true] %s3686_s28 }
  0xd3   : > { %s1178_s22 = sshll.u32 %s4362_s6, 4  ;;  %s3688_s18 = scalar_lea.hbm %s3687_s28, 16  ;;  %s1179_s22 = int_to_ptr.vmem [resolvable:$true] %s1178_s22 }
  0xd4   : > { %p3689_p7 = scmp.ne.s32.totalorder %s3687_s28, %s3688_s18  ;;  %s3692_s1 = scalar_lea.hbm %s5259_s4, 16 }
  0xd5   : > { %p3693_p10 = scmp.lt.s32.totalorder %s3687_s28, %s5259_s4  ;;  %p3694_p11 = scmp.lt.s32.totalorder %s3692_s1, %s3688_s18 }
  0xd6   : > { %p3690_p8 = pnand %p3689_p7, %p3259_p3 }
  0xd7   : > { %p3695_p12 = por %p3694_p11, %p3693_p10 }
  0xd8   : > { %p3691_p9 = pneg %p3690_p8 }
  0xda   : > { %p3696_p13 = pnand %p3695_p12, %p3691_p9 }
  0xdc   : > { %3699 = shalt.err (!%p3696_p13)
}
  0xdd   : > { %3182 = dma.hbm_to_vmem [thread:$0]  (%p3259_p3), %s4680_s2, 256, %s1179_s22, [#allocation32], %s5262_s15, %s5262_s15, %s5212_s26  }
  0xde   : > { %s4363_s23 = smov [#allocation34]   ;;  %s1231_s6 = sshll.u32 %s4533_s30, 4  ;;  %s4708_s6 = int_to_ptr.hbm [resolvable:$true] %s1231_s6 }
  0xdf   : > { %s1207_s16 = sshll.u32 %s4363_s23, 4  ;;  %s3714_s28 = sshra.s32 %s4694_s11, 4  ;;  %s1208_s16 = int_to_ptr.vmem [resolvable:$true] %s1207_s16  ;;  %s3715_s28 = int_to_ptr.hbm [resolvable:$true] %s3714_s28 }
  0xe0   : > { %s3716_s18 = scalar_lea.hbm %s3715_s28, 1  ;;  %s3720_s1 = scalar_lea.hbm %s5256_s12, 1 }
  0xe1   : > { %p3717_p0 = scmp.ne.s32.totalorder %s3715_s28, %s3716_s18  ;;  %p3721_p5 = scmp.lt.s32.totalorder %s3715_s28, %s5256_s12 }
  0xe2   : > { %p3722_p6 = scmp.lt.s32.totalorder %s3720_s1, %s3716_s18 }
  0xe3   : > { %p3718_p1 = pnand %p3717_p0, %p3259_p3 }
  0xe4   : > { %p3723_p7 = por %p3722_p6, %p3721_p5 }
  0xe5   : > { %p3719_p4 = pneg %p3718_p1 }
  0xe7   : > { %p3724_p8 = pnand %p3723_p7, %p3719_p4 }
  0xe9   : > { %3727 = shalt.err (!%p3724_p8)
}
  0xea   : > { %3186 = dma.hbm_to_vmem [thread:$0]  (%p3259_p3), %s4694_s11, 16, %s1208_s16, [#allocation35]  }
  0xeb   : > { %s1256_s2 = sshll.u32 %s5254_s14, 4  ;;  %s4364_s22 = smov [#allocation37]   ;;  %s4719_s2 = int_to_ptr.hbm [resolvable:$true] %s1256_s2 }
  0xec   : > { %s1233_s23 = sshll.u32 %s4364_s22, 4  ;;  %s3742_s28 = sshra.s32 %s4708_s6, 4  ;;  %s1234_s23 = int_to_ptr.vmem [resolvable:$true] %s1233_s23  ;;  %s3743_s28 = int_to_ptr.hbm [resolvable:$true] %s3742_s28 }
  0xed   : > { %s3744_s18 = scalar_lea.hbm %s3743_s28, 1  ;;  %s3748_s1 = scalar_lea.hbm %s4533_s30, 1 }
  0xee   : > { %p3745_p9 = scmp.ne.s32.totalorder %s3743_s28, %s3744_s18  ;;  %p3749_p12 = scmp.lt.s32.totalorder %s3743_s28, %s4533_s30 }
  0xef   : > { %p3750_p13 = scmp.lt.s32.totalorder %s3748_s1, %s3744_s18 }
  0xf0   : > { %p3746_p10 = pnand %p3745_p9, %p3259_p3 }
  0xf1   : > { %p3751_p0 = por %p3750_p13, %p3749_p12 }
  0xf2   : > { %p3747_p11 = pneg %p3746_p10 }
  0xf4   : > { %p3752_p1 = pnand %p3751_p0, %p3747_p11 }
  0xf6   : > { %3755 = shalt.err (!%p3752_p1)
}
  0xf7   : > { %3190 = dma.hbm_to_vmem [thread:$0]  (%p3259_p3), %s4708_s6, 16, %s1234_s23, [#allocation38]  }
  0xf8   : > { %s4365_s11 = smov [#allocation40]   ;;  %s1282_s22 = sshll.u32 %s4553_s25, 4  ;;  %s4730_s22 = int_to_ptr.hbm [resolvable:$true] %s1282_s22 }
  0xf9   : > { %s1258_s16 = sshll.u32 %s4365_s11, 4  ;;  %s3770_s28 = sshra.s32 %s4719_s2, 4  ;;  %s1259_s16 = int_to_ptr.vmem [resolvable:$true] %s1258_s16  ;;  %s3771_s28 = int_to_ptr.hbm [resolvable:$true] %s3770_s28 }
  0xfa   : > { %s3772_s18 = scalar_lea.hbm %s3771_s28, 16  ;;  %s3776_s1 = scalar_lea.hbm %s5254_s14, 16 }
  0xfb   : > { %p3773_p4 = scmp.ne.s32.totalorder %s3771_s28, %s3772_s18  ;;  %p3777_p7 = scmp.lt.s32.totalorder %s3771_s28, %s5254_s14 }
  0xfc   : > { %p3778_p8 = scmp.lt.s32.totalorder %s3776_s1, %s3772_s18 }
  0xfd   : > { %p3774_p5 = pnand %p3773_p4, %p3259_p3 }
  0xfe   : > { %p3779_p9 = por %p3778_p8, %p3777_p7 }
  0xff   : > { %p3775_p6 = pneg %p3774_p5 }
 0x101   : > { %p3780_p10 = pnand %p3779_p9, %p3775_p6 }
 0x103   : > { %3783 = shalt.err (!%p3780_p10)
}
 0x104   : > { %s5263_s6 = sld [smem:[#allocation62_spill]]  ;;  %s4366_s23 = smov [#allocation43]  }
 0x105   : > { %3194 = dma.hbm_to_vmem [thread:$0]  (%p3259_p3), %s4719_s2, 256, %s1259_s16, [#allocation41], %s5262_s15, %s5262_s15, %s5212_s26  }
 0x106   : > { %s1284_s11 = sshll.u32 %s4366_s23, 4  ;;  %s3798_s28 = sshra.s32 %s4730_s22, 4  ;;  %s1285_s11 = int_to_ptr.vmem [resolvable:$true] %s1284_s11  ;;  %s3799_s28 = int_to_ptr.hbm [resolvable:$true] %s3798_s28 }
 0x107   : > { %s3800_s18 = scalar_lea.hbm %s3799_s28, 16  ;;  %s3804_s1 = scalar_lea.hbm %s4553_s25, 16 }
 0x108   : > { %p3801_p11 = scmp.ne.s32.totalorder %s3799_s28, %s3800_s18  ;;  %p3805_p0 = scmp.lt.s32.totalorder %s3799_s28, %s4553_s25 }
 0x109   : > { %p3806_p1 = scmp.lt.s32.totalorder %s3804_s1, %s3800_s18 }
 0x10a   : > { %s925_s4 = sshll.u32 %s5263_s6, 4  ;;  %p3802_p12 = pnand %p3801_p11, %p3259_p3  ;;  %s4744_s4 = int_to_ptr.hbm [resolvable:$true] %s925_s4 }
 0x10b   : > { %p3807_p4 = por %p3806_p1, %p3805_p0 }
 0x10c   : > { %p3803_p13 = pneg %p3802_p12 }
 0x10e   : > { %p3808_p5 = pnand %p3807_p4, %p3803_p13 }
 0x110   : > { %3811 = shalt.err (!%p3808_p5)
}
 0x111   : > { %s5264_s2 = sld [smem:[#allocation64_spill]]  ;;  %s4367_s23 = smov [#allocation2]  }
 0x112   : > { %3198 = dma.hbm_to_vmem [thread:$0]  (%p3259_p3), %s4730_s22, 256, %s1285_s11, [#allocation44], %s5262_s15, %s5262_s15, %s5212_s26  }
 0x113   : > { %s927_s5 = sshll.u32 %s4367_s23, 4  ;;  %s3826_s28 = sshra.s32 %s4744_s4, 4  ;;  %s928_s5 = int_to_ptr.vmem [resolvable:$true] %s927_s5  ;;  %s3827_s28 = int_to_ptr.hbm [resolvable:$true] %s3826_s28 }
 0x114   : > { %s3828_s18 = scalar_lea.hbm %s3827_s28, 8  ;;  %s3832_s1 = scalar_lea.hbm %s5263_s6, 8 }
 0x115   : > { %p3829_p6 = scmp.ne.s32.totalorder %s3827_s28, %s3828_s18  ;;  %p3833_p9 = scmp.lt.s32.totalorder %s3827_s28, %s5263_s6 }
 0x116   : > { %p3834_p10 = scmp.lt.s32.totalorder %s3832_s1, %s3828_s18 }
 0x117   : > { %s949_s16 = sshll.u32 %s5264_s2, 4  ;;  %p3830_p7 = pnand %p3829_p6, %p3259_p3  ;;  %s4758_s16 = int_to_ptr.hbm [resolvable:$true] %s949_s16 }
 0x118   : > { %p3835_p11 = por %p3834_p10, %p3833_p9 }
 0x119   : > { %p3831_p8 = pneg %p3830_p7 }
 0x11b   : > { %p3836_p12 = pnand %p3835_p11, %p3831_p8 }
 0x11d   : > { %3839 = shalt.err (!%p3836_p12)
}
 0x11e   : > { %s5265_s22 = sld [smem:[#allocation65_spill]]  ;;  %s4368_s11 = smov [#allocation6]  }
 0x11f   : > { %3144 = dma.hbm_to_vmem [thread:$0]  (%p3259_p3), %s4744_s4, 128, %s928_s5, [#allocation3]  }
 0x120   : > { %s951_s23 = sshll.u32 %s4368_s11, 4  ;;  %s3854_s28 = sshra.s32 %s4758_s16, 4  ;;  %s952_s23 = int_to_ptr.vmem [resolvable:$true] %s951_s23  ;;  %s3855_s28 = int_to_ptr.hbm [resolvable:$true] %s3854_s28 }
 0x121   : > { %s3856_s18 = scalar_lea.hbm %s3855_s28, 8  ;;  %s3860_s1 = scalar_lea.hbm %s5264_s2, 8 }
 0x122   : > { %p3857_p13 = scmp.ne.s32.totalorder %s3855_s28, %s3856_s18  ;;  %p3861_p4 = scmp.lt.s32.totalorder %s3855_s28, %s5264_s2 }
 0x123   : > { %p3862_p5 = scmp.lt.s32.totalorder %s3860_s1, %s3856_s18 }
 0x124   : > { %s973_s26 = sshll.u32 %s5265_s22, 4  ;;  %p3858_p0 = pnand %p3857_p13, %p3259_p3  ;;  %s4769_s26 = int_to_ptr.hbm [resolvable:$true] %s973_s26 }
 0x125   : > { %p3863_p6 = por %p3862_p5, %p3861_p4 }
 0x126   : > { %p3859_p1 = pneg %p3858_p0 }
 0x128   : > { %p3864_p7 = pnand %p3863_p6, %p3859_p1 }
 0x12a   : > { %3867 = shalt.err (!%p3864_p7)
}
 0x12b   : > { %s5266_s5 = sld [smem:[#allocation69_spill]]  ;;  %s4369_s11 = smov [#allocation9]  }
 0x12c   : > { %3148 = dma.hbm_to_vmem [thread:$0]  (%p3259_p3), %s4758_s16, 128, %s952_s23, [#allocation5]  }
 0x12d   : > { %s975_s6 = sshll.u32 %s4369_s11, 4  ;;  %s3882_s28 = sshra.s32 %s4769_s26, 4  ;;  %s976_s6 = int_to_ptr.vmem [resolvable:$true] %s975_s6  ;;  %s3883_s28 = int_to_ptr.hbm [resolvable:$true] %s3882_s28 }
 0x12e   : > { %s3884_s18 = scalar_lea.hbm %s3883_s28, 1  ;;  %s3888_s1 = scalar_lea.hbm %s5265_s22, 1 }
 0x12f   : > { %p3885_p8 = scmp.ne.s32.totalorder %s3883_s28, %s3884_s18  ;;  %p3889_p11 = scmp.lt.s32.totalorder %s3883_s28, %s5265_s22 }
 0x130   : > { %p3890_p12 = scmp.lt.s32.totalorder %s3888_s1, %s3884_s18 }
 0x131   : > { %s1003_s4 = sshll.u32 %s5266_s5, 4  ;;  %p3886_p9 = pnand %p3885_p8, %p3259_p3  ;;  %s4780_s4 = int_to_ptr.hbm [resolvable:$true] %s1003_s4 }
 0x132   : > { %p3891_p13 = por %p3890_p12, %p3889_p11 }
 0x133   : > { %p3887_p10 = pneg %p3886_p9 }
 0x135   : > { %p3892_p0 = pnand %p3891_p13, %p3887_p10 }
 0x137   : > { %3895 = shalt.err (!%p3892_p0)
}
 0x138   : > { %s5267_s16 = sld [smem:[#allocation71_spill]]  ;;  %s4370_s23 = smov [#allocation12]  }
 0x139   : > { %3152 = dma.hbm_to_vmem [thread:$0]  (%p3259_p3), %s4769_s26, 16, %s976_s6, [#allocation8]  }
 0x13a   : > { %s1005_s11 = sshll.u32 %s4370_s23, 4  ;;  %s3910_s28 = sshra.s32 %s4780_s4, 4  ;;  %s1006_s11 = int_to_ptr.vmem [resolvable:$true] %s1005_s11  ;;  %s3911_s28 = int_to_ptr.hbm [resolvable:$true] %s3910_s28 }
 0x13b   : > { %s3912_s18 = scalar_lea.hbm %s3911_s28, 8  ;;  %s3916_s1 = scalar_lea.hbm %s5266_s5, 8 }
 0x13c   : > { %p3913_p1 = scmp.ne.s32.totalorder %s3911_s28, %s3912_s18  ;;  %p3917_p6 = scmp.lt.s32.totalorder %s3911_s28, %s5266_s5 }
 0x13d   : > { %p3918_p7 = scmp.lt.s32.totalorder %s3916_s1, %s3912_s18 }
 0x13e   : > { %s1030_s2 = sshll.u32 %s5267_s16, 4  ;;  %p3914_p4 = pnand %p3913_p1, %p3259_p3  ;;  %s4791_s2 = int_to_ptr.hbm [resolvable:$true] %s1030_s2 }
 0x13f   : > { %p3919_p8 = por %p3918_p7, %p3917_p6 }
 0x140   : > { %p3915_p5 = pneg %p3914_p4 }
 0x142   : > { %p3920_p9 = pnand %p3919_p8, %p3915_p5 }
 0x144   : > { %3923 = shalt.err (!%p3920_p9)
}
 0x145   : > { %s5268_s26 = sld [smem:[#allocation73_spill]]  ;;  %s4371_s23 = smov [#allocation15]  }
 0x146   : > { %3156 = dma.hbm_to_vmem [thread:$0]  (%p3259_p3), %s4780_s4, 128, %s1006_s11, [#allocation11]  }
 0x147   : > { %s1032_s8 = sshll.u32 %s4371_s23, 4  ;;  %s3938_s28 = sshra.s32 %s4791_s2, 4  ;;  %s1033_s8 = int_to_ptr.vmem [resolvable:$true] %s1032_s8  ;;  %s3939_s28 = int_to_ptr.hbm [resolvable:$true] %s3938_s28 }
 0x148   : > { %s3940_s18 = scalar_lea.hbm %s3939_s28, 1  ;;  %s3944_s1 = scalar_lea.hbm %s5267_s16, 1 }
 0x149   : > { %p3941_p10 = scmp.ne.s32.totalorder %s3939_s28, %s3940_s18  ;;  %p3945_p13 = scmp.lt.s32.totalorder %s3939_s28, %s5267_s16 }
 0x14a   : > { %p3946_p0 = scmp.lt.s32.totalorder %s3944_s1, %s3940_s18 }
 0x14b   : > { %s1055_s6 = sshll.u32 %s5268_s26, 4  ;;  %p3942_p11 = pnand %p3941_p10, %p3259_p3  ;;  %s4802_s6 = int_to_ptr.hbm [resolvable:$true] %s1055_s6 }
 0x14c   : > { %p3947_p1 = por %p3946_p0, %p3945_p13 }
 0x14d   : > { %p3943_p12 = pneg %p3942_p11 }
 0x14f   : > { %p3948_p4 = pnand %p3947_p1, %p3943_p12 }
 0x151   : > { %3951 = shalt.err (!%p3948_p4)
}
 0x152   : > { %s5269_s4 = sld [smem:[#allocation75_spill]]  ;;  %s4372_s11 = smov [#allocation18]  }
 0x153   : > { %3160 = dma.hbm_to_vmem [thread:$0]  (%p3259_p3), %s4791_s2, 16, %s1033_s8, [#allocation14]  }
 0x154   : > { %s1057_s23 = sshll.u32 %s4372_s11, 4  ;;  %s3966_s28 = sshra.s32 %s4802_s6, 4  ;;  %s1058_s23 = int_to_ptr.vmem [resolvable:$true] %s1057_s23  ;;  %s3967_s28 = int_to_ptr.hbm [resolvable:$true] %s3966_s28 }
 0x155   : > { %s3968_s18 = scalar_lea.hbm %s3967_s28, 16  ;;  %s3972_s1 = scalar_lea.hbm %s5268_s26, 16 }
 0x156   : > { %p3969_p5 = scmp.ne.s32.totalorder %s3967_s28, %s3968_s18  ;;  %p3973_p8 = scmp.lt.s32.totalorder %s3967_s28, %s5268_s26 }
 0x157   : > { %p3974_p9 = scmp.lt.s32.totalorder %s3972_s1, %s3968_s18 }
 0x158   : > { %s1084_s5 = sshll.u32 %s5269_s4, 4  ;;  %p3970_p6 = pnand %p3969_p5, %p3259_p3  ;;  %s4813_s5 = int_to_ptr.hbm [resolvable:$true] %s1084_s5 }
 0x159   : > { %p3975_p10 = por %p3974_p9, %p3973_p8 }
 0x15a   : > { %p3971_p7 = pneg %p3970_p6 }
 0x15c   : > { %p3976_p11 = pnand %p3975_p10, %p3971_p7 }
 0x15e   : > { %3979 = shalt.err (!%p3976_p11)
}
 0x15f   : > { %s5270_s8 = smov 8   ;;  %s5271_s2 = sld [smem:[#allocation76_spill]] }
 0x160   : > { %3164 = dma.hbm_to_vmem [thread:$0]  (%p3259_p3), %s4802_s6, 256, %s1058_s23, [#allocation17], %s5262_s15, %s5262_s15, %s5270_s8  }
 0x161   : > { %s4373_s12 = smov [#allocation21]   ;;  %s3994_s28 = sshra.s32 %s4813_s5, 4  ;;  %s3995_s28 = int_to_ptr.hbm [resolvable:$true] %s3994_s28 }
 0x162   : > { %s1086_s13 = sshll.u32 %s4373_s12, 4  ;;  %s3996_s18 = scalar_lea.hbm %s3995_s28, 16  ;;  %s1087_s13 = int_to_ptr.vmem [resolvable:$true] %s1086_s13 }
 0x163   : > { %p3997_p12 = scmp.ne.s32.totalorder %s3995_s28, %s3996_s18  ;;  %s4000_s1 = scalar_lea.hbm %s5269_s4, 16 }
 0x164   : > { %p4001_p1 = scmp.lt.s32.totalorder %s3995_s28, %s5269_s4  ;;  %p4002_p4 = scmp.lt.s32.totalorder %s4000_s1, %s3996_s18 }
 0x165   : > { %s1110_s11 = sshll.u32 %s5271_s2, 4  ;;  %p3998_p13 = pnand %p3997_p12, %p3259_p3  ;;  %s4827_s11 = int_to_ptr.hbm [resolvable:$true] %s1110_s11 }
 0x166   : > { %p4003_p5 = por %p4002_p4, %p4001_p1 }
 0x167   : > { %p3999_p0 = pneg %p3998_p13 }
 0x169   : > { %p4004_p6 = pnand %p4003_p5, %p3999_p0 }
 0x16b   : > { %4007 = shalt.err (!%p4004_p6)
}
 0x16c   : > { %s5272_s12 = sld [smem:[#allocation77_spill]]  ;;  %s4374_s6 = smov [#allocation24]  }
 0x16d   : > { %3168 = dma.hbm_to_vmem [thread:$0]  (%p3259_p3), %s4813_s5, 256, %s1087_s13, [#allocation20], %s5262_s15, %s5262_s15, %s5270_s8  }
 0x16e   : > { %s1112_s23 = sshll.u32 %s4374_s6, 4  ;;  %s4022_s28 = sshra.s32 %s4827_s11, 4  ;;  %s1113_s23 = int_to_ptr.vmem [resolvable:$true] %s1112_s23  ;;  %s4023_s28 = int_to_ptr.hbm [resolvable:$true] %s4022_s28 }
 0x16f   : > { %s4024_s18 = scalar_lea.hbm %s4023_s28, 16  ;;  %s4028_s1 = scalar_lea.hbm %s5271_s2, 16 }
 0x170   : > { %p4025_p7 = scmp.ne.s32.totalorder %s4023_s28, %s4024_s18  ;;  %p4029_p10 = scmp.lt.s32.totalorder %s4023_s28, %s5271_s2 }
 0x171   : > { %p4030_p11 = scmp.lt.s32.totalorder %s4028_s1, %s4024_s18 }
 0x172   : > { %s1136_s14 = sshll.u32 %s5272_s12, 4  ;;  %p4026_p8 = pnand %p4025_p7, %p3259_p3  ;;  %s4841_s14 = int_to_ptr.hbm [resolvable:$true] %s1136_s14 }
 0x173   : > { %p4031_p12 = por %p4030_p11, %p4029_p10 }
 0x174   : > { %p4027_p9 = pneg %p4026_p8 }
 0x176   : > { %p4032_p13 = pnand %p4031_p12, %p4027_p9 }
 0x178   : > { %4035 = shalt.err (!%p4032_p13)
}
 0x179   : > { %s5273_s13 = sld [smem:[#allocation79_spill]]  ;;  %s4375_s6 = smov [#allocation27]  }
 0x17a   : > { %3172 = dma.hbm_to_vmem [thread:$0]  (%p3259_p3), %s4827_s11, 256, %s1113_s23, [#allocation23], %s5262_s15, %s5262_s15, %s5270_s8  }
 0x17b   : > { %s1138_s4 = sshll.u32 %s4375_s6, 4  ;;  %s4050_s28 = sshra.s32 %s4841_s14, 4  ;;  %s1139_s4 = int_to_ptr.vmem [resolvable:$true] %s1138_s4  ;;  %s4051_s28 = int_to_ptr.hbm [resolvable:$true] %s4050_s28 }
 0x17c   : > { %s4052_s18 = scalar_lea.hbm %s4051_s28, 16  ;;  %s4056_s1 = scalar_lea.hbm %s5272_s12, 16 }
 0x17d   : > { %p4053_p0 = scmp.ne.s32.totalorder %s4051_s28, %s4052_s18  ;;  %p4057_p5 = scmp.lt.s32.totalorder %s4051_s28, %s5272_s12 }
 0x17e   : > { %p4058_p6 = scmp.lt.s32.totalorder %s4056_s1, %s4052_s18 }
 0x17f   : > { %s1165_s5 = sshll.u32 %s5273_s13, 4  ;;  %p4054_p1 = pnand %p4053_p0, %p3259_p3  ;;  %s4855_s5 = int_to_ptr.hbm [resolvable:$true] %s1165_s5 }
 0x180   : > { %p4059_p7 = por %p4058_p6, %p4057_p5 }
 0x181   : > { %p4055_p4 = pneg %p4054_p1 }
 0x183   : > { %p4060_p8 = pnand %p4059_p7, %p4055_p4 }
 0x185   : > { %4063 = shalt.err (!%p4060_p8)
}
 0x186   : > { %s5274_s11 = sld [smem:[#allocation81_spill]]  ;;  %s4376_s23 = smov [#allocation30]  }
 0x187   : > { %3176 = dma.hbm_to_vmem [thread:$0]  (%p3259_p3), %s4841_s14, 256, %s1139_s4, [#allocation26], %s5262_s15, %s5262_s15, %s5270_s8  }
 0x188   : > { %s1167_s6 = sshll.u32 %s4376_s23, 4  ;;  %s4078_s28 = sshra.s32 %s4855_s5, 4  ;;  %s1168_s6 = int_to_ptr.vmem [resolvable:$true] %s1167_s6  ;;  %s4079_s28 = int_to_ptr.hbm [resolvable:$true] %s4078_s28 }
 0x189   : > { %s4080_s18 = scalar_lea.hbm %s4079_s28, 1  ;;  %s4084_s1 = scalar_lea.hbm %s5273_s13, 1 }
 0x18a   : > { %p4081_p9 = scmp.ne.s32.totalorder %s4079_s28, %s4080_s18  ;;  %p4085_p12 = scmp.lt.s32.totalorder %s4079_s28, %s5273_s13 }
 0x18b   : > { %p4086_p13 = scmp.lt.s32.totalorder %s4084_s1, %s4080_s18 }
 0x18c   : > { %s1190_s2 = sshll.u32 %s5274_s11, 4  ;;  %p4082_p10 = pnand %p4081_p9, %p3259_p3  ;;  %s4869_s2 = int_to_ptr.hbm [resolvable:$true] %s1190_s2 }
 0x18d   : > { %p4087_p0 = por %p4086_p13, %p4085_p12 }
 0x18e   : > { %p4083_p11 = pneg %p4082_p10 }
 0x190   : > { %p4088_p1 = pnand %p4087_p0, %p4083_p11 }
 0x192   : > { %4091 = shalt.err (!%p4088_p1)
}
 0x193   : > { %s5275_s14 = sld [smem:[#allocation83_spill]]  ;;  %s4377_s23 = smov [#allocation33]  }
 0x194   : > { %3180 = dma.hbm_to_vmem [thread:$0]  (%p3259_p3), %s4855_s5, 16, %s1168_s6, [#allocation29]  }
 0x195   : > { %s1192_s12 = sshll.u32 %s4377_s23, 4  ;;  %s4106_s28 = sshra.s32 %s4869_s2, 4  ;;  %s1193_s12 = int_to_ptr.vmem [resolvable:$true] %s1192_s12  ;;  %s4107_s28 = int_to_ptr.hbm [resolvable:$true] %s4106_s28 }
 0x196   : > { %s4108_s18 = scalar_lea.hbm %s4107_s28, 16  ;;  %s4112_s1 = scalar_lea.hbm %s5274_s11, 16 }
 0x197   : > { %p4109_p4 = scmp.ne.s32.totalorder %s4107_s28, %s4108_s18  ;;  %p4113_p7 = scmp.lt.s32.totalorder %s4107_s28, %s5274_s11 }
 0x198   : > { %p4114_p8 = scmp.lt.s32.totalorder %s4112_s1, %s4108_s18 }
 0x199   : > { %s1216_s4 = sshll.u32 %s5275_s14, 4  ;;  %p4110_p5 = pnand %p4109_p4, %p3259_p3  ;;  %s4880_s4 = int_to_ptr.hbm [resolvable:$true] %s1216_s4 }
 0x19a   : > { %p4115_p9 = por %p4114_p8, %p4113_p7 }
 0x19b   : > { %p4111_p6 = pneg %p4110_p5 }
 0x19d   : > { %p4116_p10 = pnand %p4115_p9, %p4111_p6 }
 0x19f   : > { %4119 = shalt.err (!%p4116_p10)
}
 0x1a0   : > { %s5276_s5 = sld [smem:[#allocation84_spill]]  ;;  %s4378_s6 = smov [#allocation36]  }
 0x1a1   : > { %3184 = dma.hbm_to_vmem [thread:$0]  (%p3259_p3), %s4869_s2, 256, %s1193_s12, [#allocation32], %s5262_s15, %s5262_s15, %s5270_s8  }
 0x1a2   : > { %s1218_s23 = sshll.u32 %s4378_s6, 4  ;;  %s4134_s28 = sshra.s32 %s4880_s4, 4  ;;  %s1219_s23 = int_to_ptr.vmem [resolvable:$true] %s1218_s23  ;;  %s4135_s28 = int_to_ptr.hbm [resolvable:$true] %s4134_s28 }
 0x1a3   : > { %s4136_s18 = scalar_lea.hbm %s4135_s28, 16  ;;  %s4140_s1 = scalar_lea.hbm %s5275_s14, 16 }
 0x1a4   : > { %p4137_p11 = scmp.ne.s32.totalorder %s4135_s28, %s4136_s18  ;;  %p4141_p0 = scmp.lt.s32.totalorder %s4135_s28, %s5275_s14 }
 0x1a5   : > { %p4142_p1 = scmp.lt.s32.totalorder %s4140_s1, %s4136_s18 }
 0x1a6   : > { %s1242_s13 = sshll.u32 %s5276_s5, 4  ;;  %p4138_p12 = pnand %p4137_p11, %p3259_p3  ;;  %s4894_s13 = int_to_ptr.hbm [resolvable:$true] %s1242_s13 }
 0x1a7   : > { %p4143_p4 = por %p4142_p1, %p4141_p0 }
 0x1a8   : > { %p4139_p13 = pneg %p4138_p12 }
 0x1aa   : > { %p4144_p5 = pnand %p4143_p4, %p4139_p13 }
 0x1ac   : > { %4147 = shalt.err (!%p4144_p5)
}
 0x1ad   : > { %s5277_s2 = sld [smem:[#allocation86_spill]]  ;;  %s4379_s6 = smov [#allocation39]  }
 0x1ae   : > { %3188 = dma.hbm_to_vmem [thread:$0]  (%p3259_p3), %s4880_s4, 256, %s1219_s23, [#allocation35], %s5262_s15, %s5262_s15, %s5270_s8  }
 0x1af   : > { %s1244_s11 = sshll.u32 %s4379_s6, 4  ;;  %s4162_s28 = sshra.s32 %s4894_s13, 4  ;;  %s1245_s11 = int_to_ptr.vmem [resolvable:$true] %s1244_s11  ;;  %s4163_s28 = int_to_ptr.hbm [resolvable:$true] %s4162_s28 }
 0x1b0   : > { %s4164_s18 = scalar_lea.hbm %s4163_s28, 16  ;;  %s4168_s1 = scalar_lea.hbm %s5276_s5, 16 }
 0x1b1   : > { %p4165_p6 = scmp.ne.s32.totalorder %s4163_s28, %s4164_s18  ;;  %p4169_p9 = scmp.lt.s32.totalorder %s4163_s28, %s5276_s5 }
 0x1b2   : > { %p4170_p10 = scmp.lt.s32.totalorder %s4168_s1, %s4164_s18 }
 0x1b3   : > { %s1271_s12 = sshll.u32 %s5277_s2, 4  ;;  %p4166_p7 = pnand %p4165_p6, %p3259_p3  ;;  %s4908_s12 = int_to_ptr.hbm [resolvable:$true] %s1271_s12 }
 0x1b4   : > { %p4171_p11 = por %p4170_p10, %p4169_p9 }
 0x1b5   : > { %p4167_p8 = pneg %p4166_p7 }
 0x1b7   : > { %p4172_p12 = pnand %p4171_p11, %p4167_p8 }
 0x1b9   : > { %4175 = shalt.err (!%p4172_p12)
}
 0x1ba   : > { %3192 = dma.hbm_to_vmem [thread:$0]  (%p3259_p3), %s4894_s13, 256, %s1245_s11, [#allocation38], %s5262_s15, %s5262_s15, %s5270_s8  }
 0x1bb   : > { %s4380_s4 = smov [#allocation42]   ;;  %s1302_s6 = sshll.u32 %s4568_s29, 4  ;;  %s1303_s6 = int_to_ptr.hbm [resolvable:$true] %s1302_s6 }
 0x1bc   : > { %s1273_s23 = sshll.u32 %s4380_s4, 4  ;;  %s4190_s28 = sshra.s32 %s4908_s12, 4  ;;  %s1274_s23 = int_to_ptr.vmem [resolvable:$true] %s1273_s23  ;;  %s4191_s28 = int_to_ptr.hbm [resolvable:$true] %s4190_s28 }
 0x1bd   : > { %s4192_s18 = scalar_lea.hbm %s4191_s28, 1  ;;  %s4196_s1 = scalar_lea.hbm %s5277_s2, 1 }
 0x1be   : > { %p4193_p13 = scmp.ne.s32.totalorder %s4191_s28, %s4192_s18  ;;  %p4197_p4 = scmp.lt.s32.totalorder %s4191_s28, %s5277_s2 }
 0x1bf   : > { %p4198_p5 = scmp.lt.s32.totalorder %s4196_s1, %s4192_s18 }
 0x1c0   : > { %p4194_p0 = pnand %p4193_p13, %p3259_p3 }
 0x1c1   : > { %p4199_p6 = por %p4198_p5, %p4197_p4 }
 0x1c2   : > { %p4195_p1 = pneg %p4194_p0 }
 0x1c4   : > { %p4200_p7 = pnand %p4199_p6, %p4195_p1 }
 0x1c6   : > { %4203 = shalt.err (!%p4200_p7)
}
 0x1c7   : > { %3196 = dma.hbm_to_vmem [thread:$0]  (%p3259_p3), %s4908_s12, 16, %s1274_s23, [#allocation41]  }
 0x1c8   : > { %s4381_s13 = smov [#allocation45]   ;;  %s4218_s4 = sshra.s32 %s1303_s6, 4  ;;  %s4219_s4 = int_to_ptr.hbm [resolvable:$true] %s4218_s4 }
 0x1c9   : > { %s1304_s11 = sshll.u32 %s4381_s13, 4  ;;  %s4220_s5 = scalar_lea.hbm %s4219_s4, 16  ;;  %s1305_s11 = int_to_ptr.vmem [resolvable:$true] %s1304_s11 }
 0x1ca   : > { %p4221_p8 = scmp.ne.s32.totalorder %s4219_s4, %s4220_s5  ;;  %s4224_s28 = scalar_lea.hbm %s4568_s29, 16 }
 0x1cb   : > { %p4225_p11 = scmp.lt.s32.totalorder %s4219_s4, %s4568_s29  ;;  %p4226_p12 = scmp.lt.s32.totalorder %s4224_s28, %s4220_s5 }
 0x1cc   : > { %p4222_p9 = pnand %p4221_p8, %p3259_p3 }
 0x1cd   : > { %p4227_p13 = por %p4226_p12, %p4225_p11 }
 0x1ce   : > { %p4223_p10 = pneg %p4222_p9 }
 0x1d0   : > { %p4228_p0 = pnand %p4227_p13, %p4223_p10 }
 0x1d2   : > { %4231 = shalt.err (!%p4228_p0)
}
 0x1d3   : > { %3200 = dma.hbm_to_vmem [thread:$0]  (%p3259_p3), %s1303_s6, 256, %s1305_s11, [#allocation44], %s5262_s15, %s5262_s15, %s5270_s8  }
 0x1d4 PF: > { %1331 = sbr.rel (%p4590_p2) target bundleno = 4836 (0x12e4), region = 168  ;;  %p3288_p1 = scmp.eq.s32.totalorder (!%p4590_p2), %s4586_s0, 0 }
 0x1d9   : > { %4251 = dma.done.wait (%p3288_p1), [#allocation3], 128  }
 0x1da   : > { %4253 = vsyncadd (%p3288_p1), [#allocation3], 4294967168 }
 0x1db   : > { %4255 = dma.done.wait (%p3288_p1), [#allocation5], 144  }
 0x1dc   : > { %4257 = vsyncadd (%p3288_p1), [#allocation5], 4294967152 }
 0x1dd   : > { %4259 = dma.done.wait (%p3288_p1), [#allocation8], 144  }
 0x1de   : > { %4261 = vsyncadd (%p3288_p1), [#allocation8], 4294967152 }
 0x1df   : > { %4263 = dma.done.wait (%p3288_p1), [#allocation11], 144  }
 0x1e0   : > { %4265 = vsyncadd (%p3288_p1), [#allocation11], 4294967152 }
 0x1e1   : > { %4267 = dma.done.wait (%p3288_p1), [#allocation14], 32  }
 0x1e2   : > { %4269 = vsyncadd (%p3288_p1), [#allocation14], 4294967264 }
 0x1e3   : > { %4271 = dma.done.wait (%p3288_p1), [#allocation17], 512  }
 0x1e4   : > { %4273 = vsyncadd (%p3288_p1), [#allocation17], 4294966784 }
 0x1e5   : > { %4275 = dma.done.wait (%p3288_p1), [#allocation20], 272  }
 0x1e6   : > { %4277 = vsyncadd (%p3288_p1), [#allocation20], 4294967024 }
 0x1e7   : > { %4279 = dma.done.wait (%p3288_p1), [#allocation23], 272  }
 0x1e8   : > { %4281 = vsyncadd (%p3288_p1), [#allocation23], 4294967024 }
 0x1e9   : > { %4283 = dma.done.wait (%p3288_p1), [#allocation26], 272  }
 0x1ea   : > { %4285 = vsyncadd (%p3288_p1), [#allocation26], 4294967024 }
 0x1eb   : > { %4287 = dma.done.wait (%p3288_p1), [#allocation29], 272  }
 0x1ec   : > { %4289 = vsyncadd (%p3288_p1), [#allocation29], 4294967024 }
 0x1ed   : > { %4291 = dma.done.wait (%p3288_p1), [#allocation32], 512  }
 0x1ee   : > { %4293 = vsyncadd (%p3288_p1), [#allocation32], 4294966784 }
 0x1ef   : > { %4295 = dma.done.wait (%p3288_p1), [#allocation35], 272  }
 0x1f0   : > { %4297 = vsyncadd (%p3288_p1), [#allocation35], 4294967024 }
 0x1f1   : > { %4299 = dma.done.wait (%p3288_p1), [#allocation38], 272  }
 0x1f2   : > { %4301 = vsyncadd (%p3288_p1), [#allocation38], 4294967024 }
 0x1f3   : > { %4303 = dma.done.wait (%p3288_p1), [#allocation41], 272  }
 0x1f4   : > { %4305 = vsyncadd (%p3288_p1), [#allocation41], 4294967024 }
 0x1f5   : > { %4307 = dma.done.wait (%p3288_p1), [#allocation44], 512  }
 0x1f6   : > { %4309 = vsyncadd (%p3288_p1), [#allocation44], 4294966784  ;;  %s5278_s10 = sld [smem:[#allocation61_spill]]  ;;  %p1564_p2 = scmp.lt.s32.totalorder %s4586_s0, 1  ;;  %v1584_v0 = vld [vmem:[#allocation2] sm:$0xff]  ;;  %vm1595_vm0 = vcmask 1043456   ;;  %v1575_v19 = vlaneseq }
 0x1f7   : > { %v1587_v3 = vpack.c.bf16 %v1584_v0, %v1584_v0  ;;  %vm1591_vm1 = vcmask 64512   ;;  %v3396_v6 = vld [vmem:[#allocation4] ss:$0 sm:$0xff]  ;;  %s4382_s5 = smov 116   ;;  %s4383_s12 = smov 104   ;;  %vm1659_vm2 = vcmask 1045504  }
 0x1f8   : > { %s5285_s0 = smov (!%p1564_p2, %s4586_s0), 1  ;;  %vm1655_vm3 = vcmask 97280   ;;  %v5020_v21 = vshrl.u32 %v1575_v19, 7  ;;  %v5022_v22 = vand.u32 127, %v1575_v19  ;;  %vm1681_vm6 = vcmask 130048   ;;  %v1743_v57 = vld [vmem:[#allocation7] sm:$0xff] }
 0x1f9   : > { %s3141_s15 = sshll.u32 %s5285_s0, 4  ;;  %v1597_v4 = vsel %vm1595_vm0, %v1587_v3, 0  ;;  %v1745_v58 = vpack.c.bf16 %v1743_v57, %v1743_v57  ;;  %v1731_v60 = vld [vmem:[#allocation6] sm:$0xff]  ;;  %s5279_s23 = sld [smem:[#allocation67_spill]]  ;;  %vm1734_vm7 = vcmask 1040384   ;;  %vm2023_vm8 = vcmask 1041408  }
 0x1fa   : > { %1606 = vmatpush.bf16.msra.mxu0 %v1597_v4  ;;  %v5025_v23 = vadd.s32 8, %v5020_v21  ;;  %vm1580_vm4 = vcmp.gt.s32.totalorder %v5022_v22, %v5020_v21  ;;  %v1742_v61 = vpack.c.bf16 %v1731_v60, %v1731_v60  ;;  %s5280_s6 = sld [smem:[#allocation66_spill]]  ;;  %v3400_v60 = vld [vmem:[#allocation15] ss:$0 sm:$0xff]  ;;  %s1573_s11 = scalar_lea.vmem %s4578_s3, %s3141_s15  ;;  %vm2669_vm9 = vcmask 80896  }
 0x1fb   : > { %v1750_v59 = vsel %vm1595_vm0, %v1745_v58, 0  ;;  %s5281_s18 = sld [smem:[#allocation70_spill]] }
 0x1fc   : > { %s1568_s8 = scalar_lea.vmem %s5278_s10, %s3141_s15  ;;  %vm1581_vm5 = vcmp.gt.s32.totalorder %v5022_v22, %v5025_v23  ;;  %1759 = vmatpush.bf16.msra.mxu3 %v1750_v59  ;;  %v1770_v62 = vsel %vm1595_vm0, %v1742_v61, 0  ;;  %s5282_s1 = sld [smem:[#allocation74_spill]] }
 0x1fd   : > { %v1582_v1 = vld [vmem:[%s1568_s8] sm:$0xff]  ;;  %v1583_v2 = vld [vmem:[%s1568_s8 + $0x8] sm:$0xff]  ;;  %s5283_s13 = sld [smem:[#allocation87_spill]] }
 0x1fe   : > { %v5011_v5 = vpack.c.bf16 %v1583_v2, %v1582_v1  ;;  %1779 = vmatpush.bf16.msrb.mxu0 %v1770_v62 }
 0x200   : > { %3109 = vmatmul.msk.bf16.vlgmr.msra.gmra.mxu0 %vm1591_vm1, %v5011_v5 }
 0x27d   : > { %v1608_v7 = vpop.f32.mrf.mxu0 }
 0x27e   : > { %v1609_v8 = vadd.f32 %v3396_v6, %v1608_v7 }
 0x280   : > { %1615 = vrot.lane.b32.xlu0 %v1609_v8, %s4382_s5 }
 0x285   : > { %v1610_v9 = vpop.f32.mrf.mxu0 }
 0x286   : > { %v1611_v10 = vadd.f32 %v3396_v6, %v1610_v9 }
 0x288   : > { %1617 = vrot.lane.b32.xlu0 %v1611_v10, %s4382_s5  ;;  %v1653_v11 = vpack.c.bf16 %v1611_v10, %v1609_v8  ;;  %v1852_v8 = vld [vmem:[#allocation12] sm:$0xff] }
 0x289   : > { %v1854_v9 = vpack.c.bf16 %v1852_v8, %v1852_v8  ;;  %v1806_v10 = vld [vmem:[%s5279_s23] sm:$0xff] }
 0x28a   : > { %1711 = vrot.lane.b32.xlu2 %v1653_v11, %s4383_s12 }
 0x2e4   : > { %v1712_v12 = vpop.permute.xlu2 %1711 }
 0x2e5   : > { %1724 = vmatpush.bf16.msra.mxu2 %v1712_v12  ;;  %v1859_v12 = vsel %vm1595_vm0, %v1854_v9, 0 }
 0x2e6   : > { %1868 = vmatpush.bf16.msrb.mxu3 %v1859_v12 }
 0x2f2   : > { %v1616_v13 = vpop.permute.xlu0 %1615 }
 0x2f3   : > { %1621 = vxpose.xlu1.b32.start [1/2] (short) (narrow) %v1616_v13, 16 }
 0x2fa   : > { %v1618_v14 = vpop.permute.xlu0 %1617 }
 0x2fb   : > { %1622 = vxpose.xlu1.b32.end [2/2] (short) (narrow) %v1618_v14, 16  ;;  %v1794_v14 = vld [vmem:[%s5280_s6] sm:$0xff] }
 0x397   : > { %v1637_v15 = vpop.trf.xlu1 }
 0x39f   : > { %v1638_v16 = vpop.trf.xlu1 }
 0x3a0   : > { %v1654_v17 = vpack.c.bf16 %v1638_v16, %v1637_v15  ;;  %v1795_v15 = vld [vmem:[%s5280_s6 + $0x8] sm:$0xff] }
 0x3a1   : > { %v1805_v16 = vpack.c.bf16 %v1795_v15, %v1794_v14 }
 0x3a2   : > { %v1661_v18 = vsel %vm1659_vm2, %v1654_v17, 0 }
 0x3a3   : > { %1670 = vmatpush.bf16.msra.mxu1 %v1661_v18  ;;  %1837 = vmatpush.bf16.msrb.mxu2 %v1805_v16 }
 0x3a6   : > { %3110 = vmatmul.msk.bf16.vlgmr.msra.gmra.mxu1 %vm1655_vm3, %v1653_v11  ;;  %v1807_v11 = vld [vmem:[%s5279_s23 + $0x8] sm:$0xff] }
 0x3a7   : > { %v1809_v13 = vpack.c.bf16 %v1807_v11, %v1806_v10 }
 0x3a9   : > { %1820 = vmatpush.bf16.msrb.mxu1 %v1809_v13 }
 0x423   : > { %v1672_v20 = vpop.f32.mrf.mxu1 }
 0x424   : > { %v1677_v24 = vmul.f32 0.28867513, %v1672_v20  ;;  %v3397_v20 = vld [vmem:[#allocation9] ss:$0 sm:$0xff] }
 0x426   : > { %v1679_v26 = vsel %vm1580_vm4, -inf, %v1677_v24 }
 0x427   : > { %v1682_v29 = vsel %vm1681_vm6, %v1679_v26, -inf }
 0x42b   : > { %v1674_v25 = vpop.f32.mrf.mxu1 }
 0x42c   : > { %v1678_v27 = vmul.f32 0.28867513, %v1674_v25 }
 0x42e   : > { %v1680_v28 = vsel %vm1581_vm5, -inf, %v1678_v27 }
 0x42f   : > { %v1683_v30 = vsel %vm1681_vm6, %v1680_v28, -inf }
 0x430   : > { %v1684_v31 = vmax.f32 %v1682_v29, %v1683_v30 }
 0x432   : > { %v1685_v32 = vrot.slane %v1684_v31, 4 }
 0x434   : > { %v1686_v33 = vmax.f32 %v1684_v31, %v1685_v32 }
 0x436   : > { %v1687_v34 = vrot.slane %v1686_v33, 2 }
 0x438   : > { %v1688_v35 = vmax.f32 %v1686_v33, %v1687_v34 }
 0x43a   : > { %v1689_v36 = vrot.slane %v1688_v35, 1 }
 0x43c   : > { %v1690_v37 = vmax.f32 %v1688_v35, %v1689_v36  ;;  %v1879_v36 = vld [vmem:[%s5281_s18] sm:$0xff] }
 0x43e   : > { %v1691_v38 = vsub.f32 %v1679_v26, %v1690_v37  ;;  %v1692_v39 = vsub.f32 %v1680_v28, %v1690_v37  ;;  %v1880_v37 = vld [vmem:[%s5281_s18 + $0x8] sm:$0xff] }
 0x440   : > { %v1693_v40 = vmul.f32 1.442695, %v1691_v38  ;;  %v1695_v41 = vmul.f32 1.442695, %v1692_v39  ;;  %v1883_v38 = vpack.c.bf16 %v1880_v37, %v1879_v36 }
 0x442   : > { %3410 = vpow2.f32 %v1693_v40  ;;  %1897 = vmatpush.bf16.msra.mxu0 %v1883_v38 }
 0x443   : > { %3412 = vpow2.f32 %v1695_v41 }
 0x448   : > { %v3411_v42 = vpop.eup %3410 }
 0x449   : > { %v3413_v43 = vpop.eup %3412  ;;  %v1697_v44 = vsel %vm1681_vm6, %v3411_v42, 0.0 }
 0x44a   : > { %v1698_v45 = vsel %vm1681_vm6, %v3413_v43, 0.0 }
 0x44b   : > { %v1699_v46 = vadd.f32 %v1698_v45, %v1697_v44  ;;  %v3398_v44 = vld [vmem:[#allocation13] ss:$0 sm:$0xff] }
 0x44d   : > { %v1700_v47 = vrot.slane %v1699_v46, 4 }
 0x44f   : > { %v1701_v48 = vadd.f32 %v1700_v47, %v1699_v46 }
 0x451   : > { %v1702_v49 = vrot.slane %v1701_v48, 2 }
 0x453   : > { %v1703_v50 = vadd.f32 %v1702_v49, %v1701_v48 }
 0x455   : > { %v1704_v51 = vrot.slane %v1703_v50, 1 }
 0x457   : > { %v1705_v52 = vadd.f32 %v1704_v51, %v1703_v50 }
 0x459   : > { %3414 = vrcp.f32 %v1705_v52 }
 0x45f   : > { %v3415_v53 = vpop.eup %3414 }
 0x460   : > { %v1707_v54 = vmul.f32 %v3415_v53, %v3411_v42  ;;  %v1708_v55 = vmul.f32 %v3415_v53, %v3413_v43  ;;  %v3399_v43 = vld [vmem:[#allocation10] ss:$0 sm:$0xff] }
 0x462   : > { %v1709_v56 = vpack.c.bf16 %v1708_v55, %v1707_v54 }
 0x464   : > { %3111 = vmatmul.msk.bf16.vlgmr.msra.gmra.mxu2 %vm1681_vm6, %v1709_v56 }
 0x4e7   : > { %v1726_v63 = vpop.f32.mrf.mxu2 }
 0x4e8   : > { %v1735_v0 = vrot.slane %v1726_v63, 7 }
 0x4ea   : > { %v1740_v4 = vsel %vm1734_vm7, 0.0, %v1735_v0 }
 0x4ef   : > { %v1728_v1 = vpop.f32.mrf.mxu2 }
 0x4f0   : > { %v1736_v2 = vrot.slane %v1728_v1, 7  ;;  %v1744_v3 = vpack.c.bf16 %v1728_v1, %v1726_v63 }
 0x4f2   : > { %v1737_v6 = vsel %vm1734_vm7, %v1735_v0, %v1736_v2  ;;  %3112 = vmatmul.msk.bf16.vlgmr.msra.gmra.mxu3 %vm1591_vm1, %v1744_v3 }
 0x4f3   : > { %v1741_v7 = vpack.c.bf16 %v1737_v6, %v1740_v4 }
 0x4f5   : > { %3113 = vmatmul.msk.bf16.vlgmr.msrb.gmra.mxu0 %vm1591_vm1, %v1741_v7 }
 0x502   : > { %3116 = vmatmul.msk.bf16.vlgmr.msrb.gmra.mxu3 %vm1591_vm1, %v5011_v5 }
 0x572   : > { %v1781_v17 = vpop.f32.mrf.mxu0 }
 0x575   : > { %v1761_v18 = vpop.f32.mrf.mxu3 }
 0x576   : > { %v1782_v19 = vadd.f32 %v1781_v17, %v1761_v18 }
 0x578   : > { %v1790_v24 = vadd.f32 %v3397_v20, %v1782_v19 }
 0x57a   : > { %v1783_v25 = vpop.f32.mrf.mxu0  ;;  %v1792_v27 = vmax.f32 %v1790_v24, 0.0 }
 0x57c   : > { %v1798_v30 = vrot.slane %v1792_v27, 7 }
 0x57d   : > { %v1763_v26 = vpop.f32.mrf.mxu3 }
 0x57e   : > { %v1784_v28 = vadd.f32 %v1783_v25, %v1763_v26  ;;  %v1803_v34 = vsel %vm1734_vm7, 0.0, %v1798_v30 }
 0x580   : > { %v1791_v29 = vadd.f32 %v3397_v20, %v1784_v28 }
 0x582   : > { %v1793_v31 = vmax.f32 %v1791_v29, 0.0 }
 0x584   : > { %v1799_v32 = vrot.slane %v1793_v31, 7  ;;  %v1808_v33 = vpack.c.bf16 %v1793_v31, %v1792_v27 }
 0x585   : > { %v1870_v40 = vpop.f32.mrf.mxu3 }
 0x586   : > { %3114 = vmatmul.msk.bf16.vlgmr.msrb.gmra.mxu1 %vm1681_vm6, %v1808_v33  ;;  %v1800_v5 = vsel %vm1734_vm7, %v1798_v30, %v1799_v32  ;;  %v1871_v48 = vadd.f32 %v3398_v44, %v1870_v40 }
 0x587   : > { %v1804_v35 = vpack.c.bf16 %v1800_v5, %v1803_v34 }
 0x589   : > { %3115 = vmatmul.msk.bf16.vlgmr.msrb.gmra.mxu2 %vm1681_vm6, %v1804_v35 }
 0x58d   : > { %v1872_v51 = vpop.f32.mrf.mxu3 }
 0x58e   : > { %v1873_v54 = vadd.f32 %v3398_v44, %v1872_v51 }
 0x603   : > { %v1822_v39 = vpop.f32.mrf.mxu1 }
 0x60b   : > { %v1824_v46 = vpop.f32.mrf.mxu1 }
 0x60c   : > { %v1839_v41 = vpop.f32.mrf.mxu2 }
 0x60d   : > { %v1840_v42 = vadd.f32 %v1839_v41, %v1822_v39 }
 0x60f   : > { %v1848_v45 = vadd.f32 %v3399_v43, %v1840_v42 }
 0x611   : > { %v1850_v49 = vmax.f32 %v1848_v45, 0.0 }
 0x613   : > { %v5061_v53 = vadd.f32 %v1871_v48, %v1850_v49  ;;  %v2019_v49 = vld [vmem:[#allocation16] sm:$0xff] }
 0x614   : > { %v1841_v47 = vpop.f32.mrf.mxu2 }
 0x615   : > { %v1842_v50 = vadd.f32 %v1841_v47, %v1824_v46  ;;  %v1877_v57 = vmax.f32 %v5061_v53, 0.0  ;;  %v2032_v46 = vld [vmem:[#allocation18] sm:$0xff]  ;;  %v2033_v47 = vld [vmem:[#allocation18 + $0x8] sm:$0xff] }
 0x616   : > { %v2035_v48 = vpack.c.bf16 %v2033_v47, %v2032_v46 }
 0x617   : > { %v1849_v52 = vadd.f32 %v3399_v43, %v1842_v50  ;;  %v2020_v50 = vld [vmem:[#allocation16 + $0x8] sm:$0xff] }
 0x618   : > { %2046 = vmatpush.bf16.msra.mxu3 %v2035_v48  ;;  %v2031_v51 = vpack.c.bf16 %v2020_v50, %v2019_v49 }
 0x619   : > { %v1851_v55 = vmax.f32 %v1849_v52, 0.0 }
 0x61a   : > { %2063 = vmatpush.bf16.msrb.mxu0 %v2031_v51 }
 0x61b   : > { %v5063_v56 = vadd.f32 %v1873_v54, %v1851_v55 }
 0x61d   : > { %v1878_v58 = vmax.f32 %v5063_v56, 0.0 }
 0x61f   : > { %v1882_v59 = vpack.c.bf16 %v1878_v58, %v1877_v57 }
 0x621   : > { %3117 = vmatmul.msk.bf16.vlgmr.msra.gmra.mxu0 %vm1681_vm6, %v1882_v59 }
 0x69e   : > { %v1899_v61 = vpop.f32.mrf.mxu0 }
 0x69f   : > { %v1900_v62 = vadd.f32 %v3400_v60, %v1899_v61 }
 0x6a1   : > { %1906 = vrot.lane.b32.xlu2 %v1900_v62, %s4382_s5 }
 0x6a6   : > { %v1901_v63 = vpop.f32.mrf.mxu0 }
 0x6a7   : > { %v1902_v0 = vadd.f32 %v3400_v60, %v1901_v63 }
 0x6a9   : > { %v1944_v1 = vpack.c.bf16 %v1902_v0, %v1900_v62  ;;  %1908 = vrot.lane.b32.xlu0 %v1902_v0, %s4382_s5  ;;  %v2090_v0 = vld [vmem:[#allocation21] sm:$0xff] }
 0x6ab   : > { %1999 = vrot.lane.b32.xlu2 %v1944_v1, %s4383_s12 }
 0x6fb   : > { %v1907_v2 = vpop.permute.xlu2 %1906 }
 0x6fc   : > { %1912 = vxpose.xlu1.b32.start [1/2] (short) (narrow) %v1907_v2, 16 }
 0x705   : > { %v2000_v3 = vpop.permute.xlu2 %1999 }
 0x706   : > { %2012 = vmatpush.bf16.msra.mxu2 %v2000_v3  ;;  %v2078_v3 = vld [vmem:[%s5282_s1] sm:$0xff] }
 0x71b   : > { %v1909_v4 = vpop.permute.xlu0 %1908 }
 0x71c   : > { %1913 = vxpose.xlu1.b32.end [2/2] (short) (narrow) %v1909_v4, 16  ;;  %v2079_v4 = vld [vmem:[%s5282_s1 + $0x8] sm:$0xff] }
 0x7b8   : > { %v1928_v6 = vpop.trf.xlu1 }
 0x7c0   : > { %v1929_v7 = vpop.trf.xlu1 }
 0x7c1   : > { %v1945_v8 = vpack.c.bf16 %v1929_v7, %v1928_v6  ;;  %v2089_v6 = vpack.c.bf16 %v2079_v4, %v2078_v3 }
 0x7c3   : > { %v1950_v9 = vsel %vm1659_vm2, %v1945_v8, 0  ;;  %2121 = vmatpush.bf16.msrb.mxu2 %v2089_v6 }
 0x7c4   : > { %1959 = vmatpush.bf16.msra.mxu1 %v1950_v9 }
 0x7c7   : > { %3118 = vmatmul.msk.bf16.vlgmr.msra.gmra.mxu1 %vm1655_vm3, %v1944_v1  ;;  %v2091_v1 = vld [vmem:[#allocation21 + $0x8] sm:$0xff] }
 0x7c8   : > { %v2093_v2 = vpack.c.bf16 %v2091_v1, %v2090_v0 }
 0x7ca   : > { %2104 = vmatpush.bf16.msrb.mxu1 %v2093_v2 }
 0x844   : > { %v1961_v10 = vpop.f32.mrf.mxu1 }
 0x845   : > { %v1966_v11 = vmul.f32 0.28867513, %v1961_v10  ;;  %v3401_v10 = vld [vmem:[#allocation19] ss:$0 sm:$0xff] }
 0x847   : > { %v1968_v13 = vsel %vm1580_vm4, -inf, %v1966_v11 }
 0x848   : > { %v1970_v16 = vsel %vm1681_vm6, %v1968_v13, -inf }
 0x84c   : > { %v1963_v12 = vpop.f32.mrf.mxu1 }
 0x84d   : > { %v1967_v14 = vmul.f32 0.28867513, %v1963_v12 }
 0x84f   : > { %v1969_v15 = vsel %vm1581_vm5, -inf, %v1967_v14 }
 0x850   : > { %v1971_v17 = vsel %vm1681_vm6, %v1969_v15, -inf }
 0x851   : > { %v1972_v18 = vmax.f32 %v1970_v16, %v1971_v17 }
 0x853   : > { %v1973_v19 = vrot.slane %v1972_v18, 4 }
 0x855   : > { %v1974_v20 = vmax.f32 %v1972_v18, %v1973_v19 }
 0x857   : > { %v1975_v24 = vrot.slane %v1974_v20, 2 }
 0x859   : > { %v1976_v25 = vmax.f32 %v1974_v20, %v1975_v24 }
 0x85b   : > { %v1977_v26 = vrot.slane %v1976_v25, 1 }
 0x85d   : > { %v1978_v27 = vmax.f32 %v1976_v25, %v1977_v26 }
 0x85f   : > { %v1979_v28 = vsub.f32 %v1968_v13, %v1978_v27  ;;  %v1980_v29 = vsub.f32 %v1969_v15, %v1978_v27  ;;  %v2140_v27 = vld [vmem:[#allocation24] sm:$0xff] }
 0x861   : > { %v1981_v30 = vmul.f32 1.442695, %v1979_v28  ;;  %v1983_v31 = vmul.f32 1.442695, %v1980_v29  ;;  %v2141_v28 = vld [vmem:[#allocation24 + $0x8] sm:$0xff] }
 0x862   : > { %v2144_v29 = vpack.c.bf16 %v2141_v28, %v2140_v27 }
 0x863   : > { %3416 = vpow2.f32 %v1981_v30 }
 0x864   : > { %3418 = vpow2.f32 %v1983_v31  ;;  %2158 = vmatpush.bf16.msrb.mxu3 %v2144_v29 }
 0x869   : > { %v3417_v32 = vpop.eup %3416 }
 0x86a   : > { %v3419_v33 = vpop.eup %3418  ;;  %v1985_v34 = vsel %vm1681_vm6, %v3417_v32, 0.0 }
 0x86b   : > { %v1986_v5 = vsel %vm1681_vm6, %v3419_v33, 0.0 }
 0x86c   : > { %v1987_v35 = vadd.f32 %v1986_v5, %v1985_v34 }
 0x86e   : > { %v1988_v36 = vrot.slane %v1987_v35, 4 }
 0x870   : > { %v1989_v37 = vadd.f32 %v1988_v36, %v1987_v35 }
 0x872   : > { %v1990_v38 = vrot.slane %v1989_v37, 2 }
 0x874   : > { %v1991_v39 = vadd.f32 %v1990_v38, %v1989_v37 }
 0x876   : > { %v1992_v40 = vrot.slane %v1991_v39, 1 }
 0x878   : > { %v1993_v41 = vadd.f32 %v1992_v40, %v1991_v39 }
 0x87a   : > { %3420 = vrcp.f32 %v1993_v41 }
 0x880   : > { %v3421_v42 = vpop.eup %3420 }
 0x881   : > { %v1996_v43 = vmul.f32 %v3421_v42, %v3419_v33  ;;  %v1995_v44 = vmul.f32 %v3421_v42, %v3417_v32  ;;  %v3402_v33 = vld [vmem:[#allocation22] ss:$0 sm:$0xff] }
 0x883   : > { %v1997_v45 = vpack.c.bf16 %v1996_v43, %v1995_v44 }
 0x885   : > { %3119 = vmatmul.msk.bf16.vlgmr.msra.gmra.mxu2 %vm1681_vm6, %v1997_v45  ;;  %v3403_v45 = vld [vmem:[#allocation25] ss:$0 sm:$0xff] }
 0x908   : > { %v2014_v52 = vpop.f32.mrf.mxu2 }
 0x909   : > { %v2024_v54 = vrot.slane %v2014_v52, 6 }
 0x90b   : > { %v2029_v61 = vsel %vm2023_vm8, 0.0, %v2024_v54 }
 0x910   : > { %v2016_v55 = vpop.f32.mrf.mxu2 }
 0x911   : > { %v2025_v59 = vrot.slane %v2016_v55, 6  ;;  %v2034_v60 = vpack.c.bf16 %v2016_v55, %v2014_v52 }
 0x913   : > { %v2026_v62 = vsel %vm2023_vm8, %v2024_v54, %v2025_v59  ;;  %3120 = vmatmul.msk.bf16.vlgmr.msra.gmra.mxu3 %vm1681_vm6, %v2034_v60 }
 0x914   : > { %v2030_v63 = vpack.c.bf16 %v2026_v62, %v2029_v61 }
 0x916   : > { %3121 = vmatmul.msk.bf16.vlgmr.msrb.gmra.mxu0 %vm1681_vm6, %v2030_v63 }
 0x993   : > { %v2065_v7 = vpop.f32.mrf.mxu0 }
 0x996   : > { %v2048_v8 = vpop.f32.mrf.mxu3 }
 0x997   : > { %v2066_v9 = vadd.f32 %v2065_v7, %v2048_v8 }
 0x999   : > { %v2074_v11 = vadd.f32 %v3401_v10, %v2066_v9 }
 0x99b   : > { %v2067_v12 = vpop.f32.mrf.mxu0  ;;  %v2076_v14 = vmax.f32 %v2074_v11, 0.0 }
 0x99d   : > { %v2082_v17 = vrot.slane %v2076_v14, 6 }
 0x99e   : > { %v2050_v13 = vpop.f32.mrf.mxu3 }
 0x99f   : > { %v2068_v15 = vadd.f32 %v2067_v12, %v2050_v13  ;;  %v2087_v24 = vsel %vm2023_vm8, 0.0, %v2082_v17 }
 0x9a1   : > { %v2075_v16 = vadd.f32 %v3401_v10, %v2068_v15 }
 0x9a3   : > { %v2077_v18 = vmax.f32 %v2075_v16, 0.0 }
 0x9a5   : > { %v2083_v19 = vrot.slane %v2077_v18, 6  ;;  %v2092_v20 = vpack.c.bf16 %v2077_v18, %v2076_v14 }
 0x9a7   : > { %v2084_v25 = vsel %vm2023_vm8, %v2082_v17, %v2083_v19  ;;  %3122 = vmatmul.msk.bf16.vlgmr.msrb.gmra.mxu1 %vm1681_vm6, %v2092_v20 }
 0x9a8   : > { %v2088_v26 = vpack.c.bf16 %v2084_v25, %v2087_v24 }
 0x9aa   : > { %3123 = vmatmul.msk.bf16.vlgmr.msrb.gmra.mxu2 %vm1681_vm6, %v2088_v26 }
 0xa24   : > { %v2106_v30 = vpop.f32.mrf.mxu1 }
 0xa2c   : > { %v2108_v5 = vpop.f32.mrf.mxu1 }
 0xa2d   : > { %v2123_v31 = vpop.f32.mrf.mxu2 }
 0xa2e   : > { %v2124_v32 = vadd.f32 %v2123_v31, %v2106_v30 }
 0xa30   : > { %v2132_v34 = vadd.f32 %v3402_v33, %v2124_v32  ;;  %v2292_v32 = vld [vmem:[#allocation28] sm:$0xff] }
 0xa32   : > { %v2134_v36 = vmax.f32 %v2132_v34, 0.0 }
 0xa34   : > { %v5100_v39 = vadd.f32 %v2134_v36, %v1877_v57 }
 0xa35   : > { %v2125_v35 = vpop.f32.mrf.mxu2 }
 0xa36   : > { %v2126_v37 = vadd.f32 %v2125_v35, %v2108_v5  ;;  %v2138_v42 = vmax.f32 %v5100_v39, 0.0  ;;  %v2280_v5 = vld [vmem:[#allocation27] sm:$0xff]  ;;  %v2281_v35 = vld [vmem:[#allocation27 + $0x8] sm:$0xff] }
 0xa37   : > { %v2291_v36 = vpack.c.bf16 %v2281_v35, %v2280_v5 }
 0xa38   : > { %v2133_v38 = vadd.f32 %v3402_v33, %v2126_v37  ;;  %v2293_v33 = vld [vmem:[#allocation28 + $0x8] sm:$0xff] }
 0xa39   : > { %v2295_v34 = vpack.c.bf16 %v2293_v33, %v2292_v32  ;;  %2323 = vmatpush.bf16.msra.mxu3 %v2291_v36 }
 0xa3a   : > { %v2135_v40 = vmax.f32 %v2133_v38, 0.0 }
 0xa3b   : > { %2306 = vmatpush.bf16.msra.mxu2 %v2295_v34 }
 0xa3c   : > { %v5104_v41 = vadd.f32 %v2135_v40, %v1878_v58 }
 0xa3e   : > { %v2139_v43 = vmax.f32 %v5104_v41, 0.0 }
 0xa40   : > { %v2143_v44 = vpack.c.bf16 %v2139_v43, %v2138_v42 }
 0xa42   : > { %3124 = vmatmul.msk.bf16.vlgmr.msrb.gmra.mxu3 %vm1681_vm6, %v2143_v44 }
 0xac5   : > { %v2160_v53 = vpop.f32.mrf.mxu3 }
 0xac6   : > { %v2161_v57 = vadd.f32 %v3403_v45, %v2160_v53 }
 0xac8   : > { %2167 = vrot.lane.b32.xlu0 %v2161_v57, %s4382_s5 }
 0xacd   : > { %v2162_v46 = vpop.f32.mrf.mxu3 }
 0xace   : > { %v2163_v56 = vadd.f32 %v3403_v45, %v2162_v46 }
 0xad0   : > { %v2205_v58 = vpack.c.bf16 %v2163_v56, %v2161_v57  ;;  %2169 = vrot.lane.b32.xlu2 %v2163_v56, %s4382_s5  ;;  %v2350_v56 = vld [vmem:[#allocation33] sm:$0xff] }
 0xad2   : > { %2260 = vrot.lane.b32.xlu1 %v2205_v58, %s4383_s12 }
 0xb2a   : > { %v2170_v48 = vpop.permute.xlu2 %2169 }
 0xb3a   : > { %v2168_v47 = vpop.permute.xlu0 %2167 }
 0xb3b   : > { %2173 = vxpose.xlu0.b32.start [1/2] (short) (narrow) %v2168_v47, 16 }
 0xb43   : > { %2174 = vxpose.xlu0.b32.end [2/2] (short) (narrow) %v2170_v48, 16  ;;  %v2338_v48 = vld [vmem:[#allocation31] sm:$0xff] }
 0xb44   : > { %v2261_v49 = vpop.permute.xlu1 %2260 }
 0xb45   : > { %2273 = vmatpush.bf16.msra.mxu1 %v2261_v49  ;;  %v2339_v49 = vld [vmem:[#allocation31 + $0x8] sm:$0xff] }
 0xbdf   : > { %v2189_v50 = vpop.trf.xlu0 }
 0xbe7   : > { %v2190_v51 = vpop.trf.xlu0 }
 0xbe8   : > { %v2206_v52 = vpack.c.bf16 %v2190_v51, %v2189_v50  ;;  %v2349_v50 = vpack.c.bf16 %v2339_v49, %v2338_v48 }
 0xbea   : > { %v2211_v54 = vsel %vm1659_vm2, %v2206_v52, 0  ;;  %2381 = vmatpush.bf16.msrb.mxu1 %v2349_v50 }
 0xbeb   : > { %2220 = vmatpush.bf16.msra.mxu0 %v2211_v54 }
 0xbee   : > { %3125 = vmatmul.msk.bf16.vlgmr.msra.gmra.mxu0 %vm1655_vm3, %v2205_v58  ;;  %v2351_v58 = vld [vmem:[#allocation33 + $0x8] sm:$0xff] }
 0xbef   : > { %v2353_v47 = vpack.c.bf16 %v2351_v58, %v2350_v56 }
 0xbf1   : > { %2364 = vmatpush.bf16.msrb.mxu0 %v2353_v47 }
 0xc6b   : > { %v2222_v55 = vpop.f32.mrf.mxu0 }
 0xc6c   : > { %v2227_v59 = vmul.f32 0.28867513, %v2222_v55  ;;  %v3404_v55 = vld [vmem:[#allocation30] ss:$0 sm:$0xff] }
 0xc6e   : > { %v2229_v61 = vsel %vm1580_vm4, -inf, %v2227_v59 }
 0xc6f   : > { %v2231_v0 = vsel %vm1681_vm6, %v2229_v61, -inf }
 0xc73   : > { %v2224_v60 = vpop.f32.mrf.mxu0 }
 0xc74   : > { %v2228_v62 = vmul.f32 0.28867513, %v2224_v60 }
 0xc76   : > { %v2230_v63 = vsel %vm1581_vm5, -inf, %v2228_v62 }
 0xc77   : > { %v2232_v1 = vsel %vm1681_vm6, %v2230_v63, -inf }
 0xc78   : > { %v2233_v2 = vmax.f32 %v2231_v0, %v2232_v1 }
 0xc7a   : > { %v2234_v3 = vrot.slane %v2233_v2, 4 }
 0xc7c   : > { %v2235_v4 = vmax.f32 %v2233_v2, %v2234_v3 }
 0xc7e   : > { %v2236_v6 = vrot.slane %v2235_v4, 2 }
 0xc80   : > { %v2237_v7 = vmax.f32 %v2235_v4, %v2236_v6 }
 0xc82   : > { %v2238_v8 = vrot.slane %v2237_v7, 1 }
 0xc84   : > { %v2239_v9 = vmax.f32 %v2237_v7, %v2238_v8 }
 0xc86   : > { %v2240_v10 = vsub.f32 %v2229_v61, %v2239_v9  ;;  %v2241_v11 = vsub.f32 %v2230_v63, %v2239_v9  ;;  %v2400_v9 = vld [vmem:[#allocation36] sm:$0xff] }
 0xc88   : > { %v2242_v12 = vmul.f32 1.442695, %v2240_v10  ;;  %v2244_v13 = vmul.f32 1.442695, %v2241_v11  ;;  %v2401_v10 = vld [vmem:[#allocation36 + $0x8] sm:$0xff] }
 0xc89   : > { %v2404_v11 = vpack.c.bf16 %v2401_v10, %v2400_v9 }
 0xc8a   : > { %3422 = vpow2.f32 %v2242_v12 }
 0xc8b   : > { %3424 = vpow2.f32 %v2244_v13  ;;  %2418 = vmatpush.bf16.msrb.mxu2 %v2404_v11  ;;  %v2540_v11 = vld [vmem:[#allocation39] sm:$0xff] }
 0xc90   : > { %v3423_v14 = vpop.eup %3422 }
 0xc91   : > { %v3425_v15 = vpop.eup %3424  ;;  %v2246_v16 = vsel %vm1681_vm6, %v3423_v14, 0.0 }
 0xc92   : > { %v2247_v17 = vsel %vm1681_vm6, %v3425_v15, 0.0 }
 0xc93   : > { %v2248_v18 = vadd.f32 %v2247_v17, %v2246_v16 }
 0xc95   : > { %v2249_v19 = vrot.slane %v2248_v18, 4 }
 0xc97   : > { %v2250_v20 = vadd.f32 %v2249_v19, %v2248_v18 }
 0xc99   : > { %v2251_v24 = vrot.slane %v2250_v20, 2 }
 0xc9b   : > { %v2252_v25 = vadd.f32 %v2251_v24, %v2250_v20 }
 0xc9d   : > { %v2253_v26 = vrot.slane %v2252_v25, 1 }
 0xc9f   : > { %v2254_v27 = vadd.f32 %v2253_v26, %v2252_v25 }
 0xca1   : > { %3426 = vrcp.f32 %v2254_v27 }
 0xca7   : > { %v3427_v28 = vpop.eup %3426 }
 0xca8   : > { %v2257_v29 = vmul.f32 %v3427_v28, %v3425_v15  ;;  %v2256_v30 = vmul.f32 %v3427_v28, %v3423_v14  ;;  %v3405_v15 = vld [vmem:[#allocation34] ss:$0 sm:$0xff] }
 0xcaa   : > { %v2258_v31 = vpack.c.bf16 %v2257_v29, %v2256_v30 }
 0xcac   : > { %3126 = vmatmul.msk.bf16.vlgmr.msra.gmra.mxu1 %vm1681_vm6, %v2258_v31  ;;  %v3406_v31 = vld [vmem:[#allocation37] ss:$0 sm:$0xff] }
 0xd29   : > { %v2275_v37 = vpop.f32.mrf.mxu1 }
 0xd2a   : > { %v2284_v38 = vrot.slane %v2275_v37, 4 }
 0xd2c   : > { %v2289_v53 = vsel %vm1595_vm0, 0.0, %v2284_v38 }
 0xd31   : > { %v2277_v40 = vpop.f32.mrf.mxu1 }
 0xd32   : > { %v2285_v44 = vrot.slane %v2277_v40, 4  ;;  %v2294_v45 = vpack.c.bf16 %v2277_v40, %v2275_v37 }
 0xd34   : > { %v2286_v57 = vsel %vm1595_vm0, %v2284_v38, %v2285_v44  ;;  %3127 = vmatmul.msk.bf16.vlgmr.msra.gmra.mxu2 %vm1681_vm6, %v2294_v45 }
 0xd35   : > { %v2290_v46 = vpack.c.bf16 %v2286_v57, %v2289_v53 }
 0xd37   : > { %3128 = vmatmul.msk.bf16.vlgmr.msra.gmra.mxu3 %vm1681_vm6, %v2290_v46 }
 0xdb7   : > { %v2308_v51 = vpop.f32.mrf.mxu2 }
 0xdba   : > { %v2325_v52 = vpop.f32.mrf.mxu3 }
 0xdbb   : > { %v2326_v54 = vadd.f32 %v2325_v52, %v2308_v51 }
 0xdbd   : > { %v2334_v59 = vadd.f32 %v3404_v55, %v2326_v54 }
 0xdbf   : > { %v2310_v60 = vpop.f32.mrf.mxu2  ;;  %v2336_v62 = vmax.f32 %v2334_v59, 0.0 }
 0xdc1   : > { %v2342_v1 = vrot.slane %v2336_v62, 4 }
 0xdc2   : > { %v2327_v61 = vpop.f32.mrf.mxu3 }
 0xdc3   : > { %v2328_v63 = vadd.f32 %v2327_v61, %v2310_v60  ;;  %v2347_v6 = vsel %vm1595_vm0, 0.0, %v2342_v1 }
 0xdc5   : > { %v2335_v0 = vadd.f32 %v3404_v55, %v2328_v63 }
 0xdc7   : > { %v2337_v2 = vmax.f32 %v2335_v0, 0.0 }
 0xdc9   : > { %v2343_v3 = vrot.slane %v2337_v2, 4  ;;  %v2352_v4 = vpack.c.bf16 %v2337_v2, %v2336_v62 }
 0xdcb   : > { %v2344_v7 = vsel %vm1595_vm0, %v2342_v1, %v2343_v3  ;;  %3129 = vmatmul.msk.bf16.vlgmr.msrb.gmra.mxu0 %vm1681_vm6, %v2352_v4 }
 0xdcc   : > { %v2348_v8 = vpack.c.bf16 %v2344_v7, %v2347_v6 }
 0xdce   : > { %3130 = vmatmul.msk.bf16.vlgmr.msrb.gmra.mxu1 %vm1681_vm6, %v2348_v8 }
 0xe48   : > { %v2366_v12 = vpop.f32.mrf.mxu0 }
 0xe4b   : > { %v2383_v13 = vpop.f32.mrf.mxu1 }
 0xe4c   : > { %v2384_v14 = vadd.f32 %v2383_v13, %v2366_v12  ;;  %v2541_v12 = vld [vmem:[#allocation39 + $0x8] sm:$0xff] }
 0xe4d   : > { %v2543_v13 = vpack.c.bf16 %v2541_v12, %v2540_v11 }
 0xe4e   : > { %v2392_v16 = vadd.f32 %v3405_v15, %v2384_v14  ;;  %v2544_v14 = vld [vmem:[#allocation40] sm:$0xff] }
 0xe4f   : > { %2575 = vmatpush.bf16.msra.mxu2 %v2543_v13 }
 0xe50   : > { %v2368_v17 = vpop.f32.mrf.mxu0  ;;  %v2394_v19 = vmax.f32 %v2392_v16, 0.0 }
 0xe52   : > { %v5139_v25 = vadd.f32 %v2394_v19, %v2138_v42 }
 0xe53   : > { %v2385_v18 = vpop.f32.mrf.mxu1 }
 0xe54   : > { %v2386_v20 = vadd.f32 %v2385_v18, %v2368_v17  ;;  %v2398_v28 = vmax.f32 %v5139_v25, 0.0  ;;  %v4384_v18 = vmov 0.0  }
 0xe56   : > { %v2393_v24 = vadd.f32 %v3405_v15, %v2386_v20  ;;  %v2545_v15 = vld [vmem:[#allocation40 + $0x8] sm:$0xff] }
 0xe57   : > { %v2547_v16 = vpack.c.bf16 %v2545_v15, %v2544_v14 }
 0xe58   : > { %v2395_v26 = vmax.f32 %v2393_v24, 0.0 }
 0xe59   : > { %2558 = vmatpush.bf16.msra.mxu1 %v2547_v16 }
 0xe5a   : > { %v5143_v27 = vadd.f32 %v2395_v26, %v2139_v43  ;;  %v2590_v26 = vld [vmem:[#allocation43] sm:$0xff] }
 0xe5c   : > { %v2399_v29 = vmax.f32 %v5143_v27, 0.0 }
 0xe5e   : > { %v2403_v30 = vpack.c.bf16 %v2399_v29, %v2398_v28 }
 0xe60   : > { %3131 = vmatmul.msk.bf16.vlgmr.msrb.gmra.mxu2 %vm1681_vm6, %v2403_v30  ;;  %v2591_v30 = vld [vmem:[#allocation43 + $0x8] sm:$0xff] }
 0xee3   : > { %v2420_v39 = vpop.f32.mrf.mxu2 }
 0xee4   : > { %v2421_v42 = vadd.f32 %v3406_v31, %v2420_v39  ;;  %v2594_v39 = vld [vmem:[%s5283_s13] sm:$0xff] }
 0xee6   : > { %2427 = vrot.lane.b32.xlu2 %v2421_v42, %s4382_s5 }
 0xeeb   : > { %v2422_v32 = vpop.f32.mrf.mxu2 }
 0xeec   : > { %v2423_v41 = vadd.f32 %v3406_v31, %v2422_v32  ;;  %v2593_v31 = vpack.c.bf16 %v2591_v30, %v2590_v26 }
 0xeee   : > { %v2465_v43 = vpack.c.bf16 %v2423_v41, %v2421_v42  ;;  %2429 = vrot.lane.b32.xlu2 %v2423_v41, %s4382_s5  ;;  %v2595_v42 = vld [vmem:[%s5283_s13 + $0x8] sm:$0xff] }
 0xeef   : > { %v2597_v32 = vpack.c.bf16 %v2595_v42, %v2594_v39 }
 0xef0   : > { %2520 = vrot.lane.b32.xlu0 %v2465_v43, %s4383_s12 }
 0xf40   : > { %v2428_v33 = vpop.permute.xlu2 %2427 }
 0xf41   : > { %2433 = vxpose.xlu2.b32.start [1/2] (short) (narrow) %v2428_v33, 16 }
 0xf48   : > { %v2430_v34 = vpop.permute.xlu2 %2429 }
 0xf49   : > { %2434 = vxpose.xlu2.b32.end [2/2] (short) (narrow) %v2430_v34, 16 }
 0xf62   : > { %v2521_v5 = vpop.permute.xlu0 %2520 }
 0xf63   : > { %2533 = vmatpush.bf16.msra.mxu0 %v2521_v5 }
 0xf67   : > { %2625 = vmatpush.bf16.msrb.mxu0 %v2593_v31 }
 0xfda   : > { %v2449_v35 = vpop.trf.xlu2 }
 0xfe2   : > { %v2450_v36 = vpop.trf.xlu2 }
 0xfe3   : > { %v2466_v37 = vpack.c.bf16 %v2450_v36, %v2449_v35 }
 0xfe5   : > { %v2471_v38 = vsel %vm1659_vm2, %v2466_v37, 0 }
 0xfe6   : > { %2480 = vmatpush.bf16.msrb.mxu3 %v2471_v38 }
 0xfe9   : > { %3132 = vmatmul.msk.bf16.vlgmr.msrb.gmra.mxu3 %vm1655_vm3, %v2465_v43  ;;  %v3407_v43 = vld [vmem:[#allocation42] ss:$0 sm:$0xff] }
 0xfea   : > { %2608 = vmatpush.bf16.msra.mxu3 %v2597_v32 }
0x106c   : > { %v2482_v40 = vpop.f32.mrf.mxu3 }
0x106d   : > { %v2487_v44 = vmul.f32 0.28867513, %v2482_v40 }
0x106f   : > { %v2489_v53 = vsel %vm1580_vm4, -inf, %v2487_v44 }
0x1070   : > { %v2491_v56 = vsel %vm1681_vm6, %v2489_v53, -inf }
0x1074   : > { %v2484_v45 = vpop.f32.mrf.mxu3 }
0x1075   : > { %v2488_v57 = vmul.f32 0.28867513, %v2484_v45 }
0x1077   : > { %v2490_v46 = vsel %vm1581_vm5, -inf, %v2488_v57  ;;  %v2644_v57 = vld [vmem:[#allocation45] sm:$0xff] }
0x1078   : > { %v2492_v58 = vsel %vm1681_vm6, %v2490_v46, -inf }
0x1079   : > { %v2493_v47 = vmax.f32 %v2491_v56, %v2492_v58 }
0x107b   : > { %v2494_v48 = vrot.slane %v2493_v47, 4 }
0x107d   : > { %v2495_v49 = vmax.f32 %v2493_v47, %v2494_v48 }
0x107f   : > { %v2496_v50 = vrot.slane %v2495_v49, 2 }
0x1081   : > { %v2497_v51 = vmax.f32 %v2495_v49, %v2496_v50  ;;  %v3408_v49 = vld [vmem:[%s4563_s17] ss:$0 sm:$0xff] }
0x1083   : > { %v2498_v52 = vrot.slane %v2497_v51, 1 }
0x1085   : > { %v2499_v54 = vmax.f32 %v2497_v51, %v2498_v52 }
0x1087   : > { %v2500_v55 = vsub.f32 %v2489_v53, %v2499_v54  ;;  %v2501_v59 = vsub.f32 %v2490_v46, %v2499_v54  ;;  %v2645_v46 = vld [vmem:[#allocation45 + $0x8] sm:$0xff] }
0x1088   : > { %v2648_v56 = vpack.c.bf16 %v2645_v46, %v2644_v57 }
0x1089   : > { %v2502_v21 = vmul.f32 1.442695, %v2500_v55  ;;  %v2504_v60 = vmul.f32 1.442695, %v2501_v59 }
0x108a   : > { %2662 = vmatpush.bf16.msrb.mxu1 %v2648_v56 }
0x108b   : > { %3428 = vpow2.f32 %v2502_v21 }
0x108c   : > { %3430 = vpow2.f32 %v2504_v60 }
0x1091   : > { %v3429_v61 = vpop.eup %3428 }
0x1092   : > { %v3431_v22 = vpop.eup %3430  ;;  %v2506_v23 = vsel %vm1681_vm6, %v3429_v61, 0.0 }
0x1093   : > { %v2507_v62 = vsel %vm1681_vm6, %v3431_v22, 0.0 }
0x1094   : > { %v2508_v63 = vadd.f32 %v2507_v62, %v2506_v23 }
0x1096   : > { %v2509_v0 = vrot.slane %v2508_v63, 4 }
0x1098   : > { %v2510_v1 = vadd.f32 %v2509_v0, %v2508_v63  ;;  %v3409_v63 = vld [vmem:[%s4573_s9] ss:$0 sm:$0xff] }
0x109a   : > { %v2511_v2 = vrot.slane %v2510_v1, 2 }
0x109c   : > { %v2512_v3 = vadd.f32 %v2511_v2, %v2510_v1 }
0x109e   : > { %v2513_v4 = vrot.slane %v2512_v3, 1 }
0x10a0   : > { %v2514_v6 = vadd.f32 %v2513_v4, %v2512_v3 }
0x10a2   : > { %3432 = vrcp.f32 %v2514_v6 }
0x10a8   : > { %v3433_v7 = vpop.eup %3432 }
0x10a9   : > { %v2517_v8 = vmul.f32 %v3433_v7, %v3431_v22  ;;  %v2516_v9 = vmul.f32 %v3433_v7, %v3429_v61 }
0x10ab   : > { %v2518_v10 = vpack.c.bf16 %v2517_v8, %v2516_v9 }
0x10ad   : > { %3133 = vmatmul.msk.bf16.vlgmr.msra.gmra.mxu0 %vm1681_vm6, %v2518_v10 }
0x112a   : > { %v2535_v17 = vpop.f32.mrf.mxu0 }
0x112b   : > { %v2542_v19 = vpack.c.bf16 %v2535_v17, %v4384_v18 }
0x112d   : > { %3135 = vmatmul.msk.bf16.vlgmr.msra.gmra.mxu2 %vm1681_vm6, %v2542_v19 }
0x1132   : > { %v2537_v20 = vpop.f32.mrf.mxu0 }
0x1133   : > { %v2546_v24 = vpack.c.bf16 %v2537_v20, %v2535_v17 }
0x1135   : > { %3134 = vmatmul.msk.bf16.vlgmr.msra.gmra.mxu1 %vm1681_vm6, %v2546_v24 }
0x11b0   : > { %v2577_v41 = vpop.f32.mrf.mxu2 }
0x11b2   : > { %v2560_v33 = vpop.f32.mrf.mxu1 }
0x11b3   : > { %v2578_v34 = vadd.f32 %v2577_v41, %v2560_v33 }
0x11b5   : > { %v2586_v5 = vadd.f32 %v3407_v43, %v2578_v34 }
0x11b7   : > { %v2588_v35 = vmax.f32 %v2586_v5, 0.0 }
0x11b8   : > { %v2579_v37 = vpop.f32.mrf.mxu2 }
0x11b9   : > { %v2592_v36 = vpack.c.bf16 %v2588_v35, %v4384_v18 }
0x11ba   : > { %v2562_v38 = vpop.f32.mrf.mxu1 }
0x11bb   : > { %v2580_v40 = vadd.f32 %v2579_v37, %v2562_v38  ;;  %3137 = vmatmul.msk.bf16.vlgmr.msrb.gmra.mxu0 %vm1681_vm6, %v2592_v36 }
0x11bd   : > { %v2587_v44 = vadd.f32 %v3407_v43, %v2580_v40 }
0x11bf   : > { %v2589_v45 = vmax.f32 %v2587_v44, 0.0 }
0x11c1   : > { %v2596_v53 = vpack.c.bf16 %v2589_v45, %v2588_v35 }
0x11c3   : > { %3136 = vmatmul.msk.bf16.vlgmr.msra.gmra.mxu3 %vm1681_vm6, %v2596_v53 }
0x1238   : > { %v2627_v58 = vpop.f32.mrf.mxu0 }
0x1240   : > { %v2629_v51 = vpop.f32.mrf.mxu0 }
0x1246   : > { %v2610_v47 = vpop.f32.mrf.mxu3 }
0x1247   : > { %v2628_v48 = vadd.f32 %v2627_v58, %v2610_v47 }
0x1249   : > { %v2636_v50 = vadd.f32 %v3408_v49, %v2628_v48 }
0x124b   : > { %v2638_v54 = vmax.f32 %v2636_v50, 0.0 }
0x124d   : > { %v2640_v21 = vadd.f32 %v2638_v54, %v2398_v28 }
0x124e   : > { %v2612_v52 = vpop.f32.mrf.mxu3 }
0x124f   : > { %v2630_v55 = vadd.f32 %v2629_v51, %v2612_v52  ;;  %v2642_v22 = vmax.f32 %v2640_v21, 0.0 }
0x1251   : > { %v2637_v59 = vadd.f32 %v3408_v49, %v2630_v55 }
0x1253   : > { %v2639_v60 = vmax.f32 %v2637_v59, 0.0 }
0x1255   : > { %v2641_v61 = vadd.f32 %v2639_v60, %v2399_v29 }
0x1257   : > { %v2643_v23 = vmax.f32 %v2641_v61, 0.0 }
0x1259   : > { %v2647_v62 = vpack.c.bf16 %v2643_v23, %v2642_v22 }
0x125b   : > { %3138 = vmatmul.msk.bf16.vlgmr.msrb.gmra.mxu1 %vm1681_vm6, %v2647_v62 }
0x12d8   : > { %v2664_v0 = vpop.f32.mrf.mxu1 }
0x12d9   : > { %v2665_v1 = vadd.f32 %v3409_v63, %v2664_v0 }
0x12db   : > { %2670 = vst.msk [vmem:[%s1573_s11] sm:$0xff] %vm2669_vm9, %v2665_v1 }
0x12e0   : > { %v2666_v2 = vpop.f32.mrf.mxu1 }
0x12e1   : > { %v2667_v3 = vadd.f32 %v3409_v63, %v2666_v2 }
0x12e3   : > { %2671 = vst.msk [vmem:[%s1573_s11 + $0x8] sm:$0xff] %vm2669_vm9, %v2667_v3 }
0x12e4 PF: > { %s100_s7 = sadd.s32 1, %s4312_s7  }
0x12e5   : > { %p97_p3 = scmp.ge.s32.totalorder %s100_s7, 4  }
0x12e7   :  { %99 = sbr.rel (!%p97_p3) target bundleno = 83 (0x53), region = 352 }
0x12ec   :  { %2693 = vsyncpa [#allocation3], 1 }
0x12ed   :  { %2695 = vsyncpa [#allocation3 + $0x1], 1 }
0x12ee   :  { %2696 = vsyncpa [#allocation5], 1 }
0x12ef   :  { %2697 = vsyncpa [#allocation8], 1 }
0x12f0   :  { %2698 = vsyncpa [#allocation11], 1 }
0x12f1   :  { %2699 = vsyncpa [#allocation14], 1 }
0x12f2   :  { %2700 = vsyncpa [#allocation17], 1 }
0x12f3   :  { %2701 = vsyncpa [#allocation20], 1 }
0x12f4   :  { %2702 = vsyncpa [#allocation23], 1 }
0x12f5   :  { %2703 = vsyncpa [#allocation26], 1 }
0x12f6   :  { %2704 = vsyncpa [#allocation29], 1 }
0x12f7   :  { %2705 = vsyncpa [#allocation32], 1 }
0x12f8   :  { %2706 = vsyncpa [#allocation35], 1 }
0x12f9   :  { %2707 = vsyncpa [#allocation38], 1 }
0x12fa   :  { %2708 = vsyncpa [#allocation41], 1 }
0x12fb   :  { %2709 = vsyncpa [#allocation44], 1 }

</bundles_post_ra>
